<compile_context>
chip_gen: v7x
topology: tpu7x:2x2x1
jax: 0.10.0
libtpu: 0.0.40
codegen_flags: <defaults>
</compile_context>

<pallas_src>
import jax
import jax.numpy as jnp
from jax.experimental import pallas as pl
from jax.experimental.pallas import tpu as pltpu

DENSE_DIM = 139                     # 267 - 2*64 normalized dense features
EMB_DIM = 64
IN_DIM = DENSE_DIM + 2 * EMB_DIM    # 267 (original fc1 input width)
OBS_DIM = DENSE_DIM + 2             # 141 = dense + raw month + raw hour
HID = 512
OUT_DIM = 500
B_PAD = 8                           # pad batch (1) to one full sublane group
N_LAYERS = 6
LAYERS_PER_STEP = 2
N_STEPS = N_LAYERS // LAYERS_PER_STEP   # 3 grid steps, 2 fused layers each
MONTH_COL = 384                     # one-hot month lanes 384..395
HOUR_COL = 400                      # one-hot hour lanes 400..423


def _mlp_kernel(idx_ref,            # SMEM scalar prefetch: [month-1, hour]
                obs_ref,            # VMEM (1, 512) fp32 padded obs row
                w_ref,              # VMEM (2, 512, 512) bf16 fused layer weights
                b_ref,              # VMEM (2, 1, 512) fp32 fused layer biases
                o_ref,              # VMEM (8, 512) fp32 output
                x_ref):             # persistent VMEM scratch (8, 512) bf16
    step = pl.program_id(0)
    n_steps = pl.num_programs(0)

    @pl.when(step == 0)
    def _build_input():
        # Row 0 = [padded obs (141 cols; raw month/hour at cols 139/140 hit
        # all-zero weight rows), one-hot month at MONTH_COL+m, one-hot hour at
        # HOUR_COL+h].  Rows 1..7 are batch padding (zeroed here; they pick up
        # ReLU(bias) garbage in later layers, which is harmless and sliced off).
        m = idx_ref[0]
        h = idx_ref[1]
        lane = jax.lax.broadcasted_iota(jnp.int32, (B_PAD, HID), 1)
        row = jax.lax.broadcasted_iota(jnp.int32, (B_PAD, HID), 0)
        onehot = ((lane == MONTH_COL + m) |
                  (lane == HOUR_COL + h)).astype(jnp.float32)
        x0 = jnp.where(row == 0, obs_ref[...] + onehot, 0.0)
        x_ref[...] = x0.astype(jnp.bfloat16)

    # Two fused layers per grid step (static unroll).  bf16 MXU inputs, fp32
    # accumulation, fp32 bias/ReLU; hidden activations stored back as bf16.
    y = None
    for i in range(LAYERS_PER_STEP):
        y = jnp.dot(x_ref[...], w_ref[i],
                    preferred_element_type=jnp.float32) + b_ref[i]
        if i < LAYERS_PER_STEP - 1:
            x_ref[...] = jnp.maximum(y, 0.0).astype(jnp.bfloat16)

    @pl.when(step < n_steps - 1)
    def _store_hidden():
        x_ref[...] = jnp.maximum(y, 0.0).astype(jnp.bfloat16)

    @pl.when(step == n_steps - 1)
    def _store_out():
        o_ref[...] = y                      # final layer: no ReLU


def pack_params(p):
    """One-time (outside the hot path) re-layout of the module's parameters."""
    # Weights: [6, 512, 512] bf16.  Layer 0 has the embedding tables folded in:
    #   rows 0:139     -> fc1 dense-feature rows
    #   rows 384:396   -> emb_month @ fc1.w[139:203]   (12, 512)
    #   rows 400:424   -> emb_hour  @ fc1.w[203:267]   (24, 512)
    # All other layer-0 rows (incl. 139/140 where the raw month/hour floats sit
    # in the obs vector) are zero.  Layer 5 output cols padded 500 -> 512.
    w = jnp.zeros((N_LAYERS, HID, HID), jnp.float32)

    w1 = jnp.zeros((HID, HID), jnp.float32)
    w1 = w1.at[:DENSE_DIM, :].set(p["fc1.w"][:DENSE_DIM, :])
    fold_month = p["emb_month"] @ p["fc1.w"][DENSE_DIM:DENSE_DIM + EMB_DIM, :]
    fold_hour = p["emb_hour"] @ p["fc1.w"][DENSE_DIM + EMB_DIM:IN_DIM, :]
    w1 = w1.at[MONTH_COL:MONTH_COL + 12, :].set(fold_month)
    w1 = w1.at[HOUR_COL:HOUR_COL + 24, :].set(fold_hour)
    w = w.at[0].set(w1)

    for i in range(2, 6):
        w = w.at[i - 1].set(p[f"fc{i}.w"])
    w6 = jnp.zeros((HID, HID), jnp.float32).at[:, :OUT_DIM].set(p["fc6.w"])
    w = w.at[5].set(w6)

    # Biases: [6, 1, 512] fp32 (fc6 zero-padded 500 -> 512).
    b = jnp.zeros((N_LAYERS, 1, HID), jnp.float32)
    for i in range(1, 6):
        b = b.at[i - 1, 0, :].set(p[f"fc{i}.b"])
    b = b.at[5, 0, :OUT_DIM].set(p["fc6.b"])

    return {"w": w.astype(jnp.bfloat16), "b": b}


@jax.jit
def unitary_action_forward(obs_vec, packed):
    """obs_vec: [1, 141] float32 = [normalized dense(139), month-1, hour_of_day]."""
    obs = obs_vec.astype(jnp.float32)                                  # [1, 141]
    # jnp.round (not truncation) so 3.9999 still maps to month index 4.
    # Expected domain: month-1 in [0, 11], hour_of_day in [0, 23].
    idx = jnp.round(obs[0, DENSE_DIM:DENSE_DIM + 2]).astype(jnp.int32)  # [2]
    # Lane-dense obs row (layout plumbing only; cols 141..511 are zero and the
    # raw month/hour floats at 139/140 hit zero weight rows).
    obs_pad = jnp.zeros((1, HID), jnp.float32).at[:, :OBS_DIM].set(obs)

    out = pl.pallas_call(
        _mlp_kernel,
        out_shape=jax.ShapeDtypeStruct((B_PAD, HID), jnp.float32),
        grid_spec=pltpu.PrefetchScalarGridSpec(
            num_scalar_prefetch=1,
            grid=(N_STEPS,),
            in_specs=[
                pl.BlockSpec((1, HID), lambda s, idx: (0, 0)),             # obs row
                pl.BlockSpec((LAYERS_PER_STEP, HID, HID),
                             lambda s, idx: (s, 0, 0)),                    # 2 weights
                pl.BlockSpec((LAYERS_PER_STEP, 1, HID),
                             lambda s, idx: (s, 0, 0)),                    # 2 biases
            ],
            out_specs=pl.BlockSpec((B_PAD, HID), lambda s, idx: (0, 0)),
            scratch_shapes=[pltpu.VMEM((B_PAD, HID), jnp.bfloat16)],
        ),
        compiler_params=pltpu.CompilerParams(
            dimension_semantics=("arbitrary",)),                            # sequential
    )(idx, obs_pad, packed["w"], packed["b"])

    # Row 0 is the real batch element; rows 1..7 are padding garbage.
    return out[:1, :OUT_DIM]                                               # [1, 500]


def _reference_forward_f32(obs_vec, params):
    """Pure-JAX fp32 reference, mirrors the PyTorch forward exactly."""
    dense = obs_vec[:, :DENSE_DIM].astype(jnp.float32)
    month = jnp.round(obs_vec[:, DENSE_DIM]).astype(jnp.int32)
    hour = jnp.round(obs_vec[:, DENSE_DIM + 1]).astype(jnp.int32)
    x = jnp.concatenate(
        [dense, params["emb_month"][month], params["emb_hour"][hour]], axis=1)
    for i in range(1, 6):
        x = jax.nn.relu(x @ params[f"fc{i}.w"] + params[f"fc{i}.b"])
    return x @ params["fc6.w"] + params["fc6.b"]


def _reference_forward_packed(obs_vec, packed):
    """Reference matching the kernel's numerics exactly (packed bf16 weights,
    folded embeddings as one-hot lanes, fp32 accumulation, bf16 activations)."""
    obs = obs_vec.astype(jnp.float32)
    m = jnp.round(obs[0, DENSE_DIM]).astype(jnp.int32)
    h = jnp.round(obs[0, DENSE_DIM + 1]).astype(jnp.int32)
    x = jnp.zeros((1, HID), jnp.float32).at[:, :OBS_DIM].set(obs)
    x = x.at[0, MONTH_COL + m].add(1.0)
    x = x.at[0, HOUR_COL + h].add(1.0)
    x = x.astype(jnp.bfloat16)
    y = None
    for l in range(N_LAYERS):
        y = jnp.dot(x, packed["w"][l],
                    preferred_element_type=jnp.float32) + packed["b"][l]
        if l < N_LAYERS - 1:
            x = jnp.maximum(y, 0.0).astype(jnp.bfloat16)
    return y[:, :OUT_DIM]


def _init_params(key):
    """Deterministic synthetic parameters with the module's shapes."""
    keys = jax.random.split(key, 16)
    p = {}
    p["emb_month"] = jax.random.normal(keys[0], (12, EMB_DIM), jnp.float32) * 0.1
    p["emb_hour"] = jax.random.normal(keys[1], (24, EMB_DIM), jnp.float32) * 0.1
    dims = [(IN_DIM, HID), (HID, HID), (HID, HID),
            (HID, HID), (HID, HID), (HID, OUT_DIM)]
    for i, (din, dout) in enumerate(dims, start=1):
        kw, kb = keys[2 * i], keys[2 * i + 1]
        scale = 1.0 / jnp.sqrt(jnp.float32(din))
        p[f"fc{i}.w"] = jax.random.normal(kw, (din, dout), jnp.float32) * scale
        p[f"fc{i}.b"] = jax.random.normal(kb, (dout,), jnp.float32) * 0.01
    return p


if __name__ == "__main__":
    key = jax.random.PRNGKey(0)
    k_par, k_obs = jax.random.split(key)
    params = _init_params(k_par)
    packed = jax.tree_util.tree_map(jax.block_until_ready, pack_params(params))

    # Synthetic obs_vec: 139 normalized dense features + month idx + hour idx.
    dense = jax.random.normal(k_obs, (1, DENSE_DIM), jnp.float32)
    month = jnp.array([[4.0]], jnp.float32)    # month - 1, in [0, 11]
    hour = jnp.array([[13.0]], jnp.float32)    # hour_of_day, in [0, 23]
    obs_vec = jnp.concatenate([dense, month, hour], axis=1)     # [1, 141]

    out = unitary_action_forward(obs_vec, packed)
    out = jax.block_until_ready(out)
    assert out.shape == (1, OUT_DIM), out.shape

    # Strict check vs a reference that uses the kernel's exact precision recipe.
    ref_packed = _reference_forward_packed(obs_vec, packed)
    assert jnp.allclose(out, ref_packed, atol=1e-3, rtol=1e-3), float(
        jnp.max(jnp.abs(out - ref_packed)))

    # Loose check vs the original full-fp32 module semantics (bf16 weight quant).
    ref_f32 = _reference_forward_f32(obs_vec, params)
    assert jnp.allclose(out, ref_f32, atol=1e-1, rtol=1e-1), float(
        jnp.max(jnp.abs(out - ref_f32)))

    print("KERNEL_OK")
</pallas_src>

<mosaic_0001>
module attributes {stable_mosaic.version = 11 : i64} {
  func.func @_mlp_kernel(%arg0: i32, %arg1: memref<2xi32, #tpu.memory_space<smem>>, %arg2: memref<1x512xf32, #tpu.memory_space<vmem>>, %arg3: memref<2x512x512xbf16, #tpu.memory_space<vmem>>, %arg4: memref<2x1x512xf32, #tpu.memory_space<vmem>>, %arg5: memref<8x512xf32, #tpu.memory_space<vmem>>, %arg6: memref<8x512xbf16, #tpu.memory_space<vmem>>) attributes {dimension_semantics = [#tpu.dimension_semantics<arbitrary>], iteration_bounds = array<i64: 3>, scalar_prefetch = 1 : i64, scratch_operands = 1 : i64, tpu.core_type = #tpu.core_type<tc>, window_params = [{pipeline_mode = #tpu.pipeline_mode<synchronous>, transform_indices = @transform_0, window_bounds = array<i64: 1, 512>}, {transform_indices = @transform_1, window_bounds = array<i64: 2, 512, 512>}, {transform_indices = @transform_2, window_bounds = array<i64: 2, 1, 512>}, {pipeline_mode = #tpu.pipeline_mode<synchronous>, transform_indices = @transform_3, window_bounds = array<i64: 8, 512>}]} {
    %c0_i32 = arith.constant 0 : i32
    %0 = arith.cmpi eq, %arg0, %c0_i32 : i32
    %1 = arith.extui %0 : i1 to i32
    %c0_i32_0 = arith.constant 0 : i32
    %2 = arith.cmpi ne, %1, %c0_i32_0 : i32
    scf.if %2 {
      %c0_22 = arith.constant 0 : index
      %29 = memref.load %arg1[%c0_22] : memref<2xi32, #tpu.memory_space<smem>>
      %c1_23 = arith.constant 1 : index
      %30 = memref.load %arg1[%c1_23] : memref<2xi32, #tpu.memory_space<smem>>
      %31 = tpu.iota {dimensions = array<i32: 1>} : vector<8x512xi32>
      %32 = tpu.iota {dimensions = array<i32: 0>} : vector<8x512xi32>
      %c384_i32 = arith.constant 384 : i32
      %33 = arith.addi %c384_i32, %29 : i32
      %34 = vector.broadcast %33 : i32 to vector<8x512xi32>
      %35 = arith.cmpi eq, %31, %34 : vector<8x512xi32>
      %c400_i32 = arith.constant 400 : i32
      %36 = arith.addi %c400_i32, %30 : i32
      %37 = vector.broadcast %36 : i32 to vector<8x512xi32>
      %38 = arith.cmpi eq, %31, %37 : vector<8x512xi32>
      %39 = arith.ori %35, %38 : vector<8x512xi1>
      %40 = arith.extui %39 : vector<8x512xi1> to vector<8x512xi32>
      %41 = arith.sitofp %40 : vector<8x512xi32> to vector<8x512xf32>
      %c0_i32_24 = arith.constant 0 : i32
      %42 = vector.broadcast %c0_i32_24 : i32 to vector<8x512xi32>
      %43 = arith.cmpi eq, %32, %42 : vector<8x512xi32>
      %c0_25 = arith.constant 0 : index
      %c0_26 = arith.constant 0 : index
      %44 = vector.load %arg2[%c0_25, %c0_26] : memref<1x512xf32, #tpu.memory_space<vmem>>, vector<1x512xf32>
      %45 = vector.broadcast %44 : vector<1x512xf32> to vector<8x512xf32>
      %46 = arith.addf %45, %41 : vector<8x512xf32>
      %cst_27 = arith.constant 0.000000e+00 : f32
      %47 = vector.broadcast %cst_27 : f32 to vector<8x512xf32>
      %48 = arith.select %43, %46, %47 : vector<8x512xi1>, vector<8x512xf32>
      %49 = arith.truncf %48 : vector<8x512xf32> to vector<8x512xbf16>
      %c0_28 = arith.constant 0 : index
      %c0_29 = arith.constant 0 : index
      %50 = vector.load %arg6[%c0_28, %c0_29] : memref<8x512xbf16, #tpu.memory_space<vmem>>, vector<8x512xbf16>
      tpu.vector_store %arg6[%c0_28, %c0_29], %49 {strides = array<i32>} : memref<8x512xbf16, #tpu.memory_space<vmem>>, vector<8x512xbf16>,
    } else {
    }
    %c0 = arith.constant 0 : index
    %c0_1 = arith.constant 0 : index
    %3 = vector.load %arg6[%c0, %c0_1] : memref<8x512xbf16, #tpu.memory_space<vmem>>, vector<8x512xbf16>
    %c0_2 = arith.constant 0 : index
    %c0_3 = arith.constant 0 : index
    %c0_4 = arith.constant 0 : index
    %4 = vector.load %arg3[%c0_2, %c0_3, %c0_4] : memref<2x512x512xbf16, #tpu.memory_space<vmem>>, vector<1x512x512xbf16>
    %5 = vector.shape_cast %4 : vector<1x512x512xbf16> to vector<512x512xbf16>
    %cst = arith.constant dense<0.000000e+00> : vector<8x512xf32>
    %6 = tpu.matmul %3, %5, %cst {dimension_numbers = #tpu.dot_dimension_numbers<[1], [0], [0], [1], [0, 0, 1, 1], [], []>} : vector<8x512xbf16>, vector<512x512xbf16>, vector<8x512xf32> -> vector<8x512xf32>
    %c0_5 = arith.constant 0 : index
    %c0_6 = arith.constant 0 : index
    %c0_7 = arith.constant 0 : index
    %7 = vector.load %arg4[%c0_5, %c0_6, %c0_7] : memref<2x1x512xf32, #tpu.memory_space<vmem>>, vector<1x1x512xf32>
    %8 = vector.shape_cast %7 : vector<1x1x512xf32> to vector<1x512xf32>
    %9 = vector.broadcast %8 : vector<1x512xf32> to vector<8x512xf32>
    %10 = arith.addf %6, %9 : vector<8x512xf32>
    %cst_8 = arith.constant 0.000000e+00 : f32
    %11 = vector.broadcast %cst_8 : f32 to vector<8x512xf32>
    %12 = arith.maximumf %10, %11 : vector<8x512xf32>
    %13 = arith.truncf %12 : vector<8x512xf32> to vector<8x512xbf16>
    %c0_9 = arith.constant 0 : index
    %c0_10 = arith.constant 0 : index
    %14 = vector.load %arg6[%c0_9, %c0_10] : memref<8x512xbf16, #tpu.memory_space<vmem>>, vector<8x512xbf16>
    tpu.vector_store %arg6[%c0_9, %c0_10], %13 {strides = array<i32>} : memref<8x512xbf16, #tpu.memory_space<vmem>>, vector<8x512xbf16>,
    %c0_11 = arith.constant 0 : index
    %c0_12 = arith.constant 0 : index
    %15 = vector.load %arg6[%c0_11, %c0_12] : memref<8x512xbf16, #tpu.memory_space<vmem>>, vector<8x512xbf16>
    %c1 = arith.constant 1 : index
    %c0_13 = arith.constant 0 : index
    %c0_14 = arith.constant 0 : index
    %16 = vector.load %arg3[%c1, %c0_13, %c0_14] : memref<2x512x512xbf16, #tpu.memory_space<vmem>>, vector<1x512x512xbf16>
    %17 = vector.shape_cast %16 : vector<1x512x512xbf16> to vector<512x512xbf16>
    %cst_15 = arith.constant dense<0.000000e+00> : vector<8x512xf32>
    %18 = tpu.matmul %15, %17, %cst_15 {dimension_numbers = #tpu.dot_dimension_numbers<[1], [0], [0], [1], [0, 0, 1, 1], [], []>} : vector<8x512xbf16>, vector<512x512xbf16>, vector<8x512xf32> -> vector<8x512xf32>
    %c1_16 = arith.constant 1 : index
    %c0_17 = arith.constant 0 : index
    %c0_18 = arith.constant 0 : index
    %19 = vector.load %arg4[%c1_16, %c0_17, %c0_18] : memref<2x1x512xf32, #tpu.memory_space<vmem>>, vector<1x1x512xf32>
    %20 = vector.shape_cast %19 : vector<1x1x512xf32> to vector<1x512xf32>
    %21 = vector.broadcast %20 : vector<1x512xf32> to vector<8x512xf32>
    %22 = arith.addf %18, %21 : vector<8x512xf32>
    %c2_i32 = arith.constant 2 : i32
    %23 = arith.cmpi slt, %arg0, %c2_i32 : i32
    %24 = arith.extui %23 : i1 to i32
    %c0_i32_19 = arith.constant 0 : i32
    %25 = arith.cmpi ne, %24, %c0_i32_19 : i32
    scf.if %25 {
      %cst_22 = arith.constant 0.000000e+00 : f32
      %29 = vector.broadcast %cst_22 : f32 to vector<8x512xf32>
      %30 = arith.maximumf %22, %29 : vector<8x512xf32>
      %31 = arith.truncf %30 : vector<8x512xf32> to vector<8x512xbf16>
      %c0_23 = arith.constant 0 : index
      %c0_24 = arith.constant 0 : index
      %32 = vector.load %arg6[%c0_23, %c0_24] : memref<8x512xbf16, #tpu.memory_space<vmem>>, vector<8x512xbf16>
      tpu.vector_store %arg6[%c0_23, %c0_24], %31 {strides = array<i32>} : memref<8x512xbf16, #tpu.memory_space<vmem>>, vector<8x512xbf16>,
    } else {
    }
    %c2_i32_20 = arith.constant 2 : i32
    %26 = arith.cmpi eq, %arg0, %c2_i32_20 : i32
    %27 = arith.extui %26 : i1 to i32
    %c0_i32_21 = arith.constant 0 : i32
    %28 = arith.cmpi ne, %27, %c0_i32_21 : i32
    scf.if %28 {
      %c0_22 = arith.constant 0 : index
      %c0_23 = arith.constant 0 : index
      %29 = vector.load %arg5[%c0_22, %c0_23] : memref<8x512xf32, #tpu.memory_space<vmem>>, vector<8x512xf32>
      tpu.vector_store %arg5[%c0_22, %c0_23], %22 {strides = array<i32>} : memref<8x512xf32, #tpu.memory_space<vmem>>, vector<8x512xf32>,
    } else {
    }
    return
  }
  func.func @transform_0(%arg0: i32, %arg1: memref<2xi32, #tpu.memory_space<smem>>) -> (i32, i32) {
    %c0_i32 = arith.constant 0 : i32
    %c0_i32_0 = arith.constant 0 : i32
    %c0_i32_1 = arith.constant 0 : i32
    return %c0_i32, %c0_i32_0 : i32, i32
  }
  func.func @transform_1(%arg0: i32, %arg1: memref<2xi32, #tpu.memory_space<smem>>) -> (i32, i32, i32) {
    %c0_i32 = arith.constant 0 : i32
    %c0_i32_0 = arith.constant 0 : i32
    %c0_i32_1 = arith.constant 0 : i32
    return %arg0, %c0_i32, %c0_i32_0 : i32, i32, i32
  }
  func.func @transform_2(%arg0: i32, %arg1: memref<2xi32, #tpu.memory_space<smem>>) -> (i32, i32, i32) {
    %c0_i32 = arith.constant 0 : i32
    %c0_i32_0 = arith.constant 0 : i32
    %c0_i32_1 = arith.constant 0 : i32
    return %arg0, %c0_i32, %c0_i32_0 : i32, i32, i32
  }
  func.func @transform_3(%arg0: i32, %arg1: memref<2xi32, #tpu.memory_space<smem>>) -> (i32, i32) {
    %c0_i32 = arith.constant 0 : i32
    %c0_i32_0 = arith.constant 0 : i32
    %c0_i32_1 = arith.constant 0 : i32
    return %c0_i32, %c0_i32_0 : i32, i32
  }
}

</mosaic_0001>

<bundles_post_ra>
// kernel: unitary_action_forward.1
= control target key start
LH: loop header
LB: loop body
LE: loop exit
PB: predicated region body
PF: predicated region fallthrough
CT: control target
= control target key end

     0   :  { %s3886_s0 = inlined_call_operand.vmem [shape: s32[2], index: 0, kind: input, shape index: {}]   ;;  %s3887_s1 = inlined_call_operand.vmem [shape: f32[1,512], index: 1, kind: input, shape index: {}]   ;;  %s3888_s2 = inlined_call_operand.hbm [shape: bf16[6,512,512], index: 2, kind: input, shape index: {}]   ;;  %s3889_s3 = inlined_call_operand.hbm [shape: f32[6,1,512], index: 3, kind: input, shape index: {}]   ;;  %s3890_s4 = inlined_call_operand.vmem [shape: f32[8,512], index: 4, kind: output, shape index: {}]  }
   0x1   :  { %s9_s17 = sshll.u32 %s3886_s0, 4  ;;  %s10_s17 = int_to_ptr.vmem [resolvable:$true] %s9_s17 }
   0x2   :  { %s3272_s18 = scalar_lea.vmem %s10_s17, 16  ;;  %p3277_p1 = scmp.lt.s32.totalorder %s10_s17, %s10_s17 }
   0x3   :  { %p3273_p0 = scmp.ne.s32.totalorder %s10_s17, %s3272_s18  ;;  %p3278_p2 = scmp.lt.s32.totalorder %s3272_s18, %s3272_s18 }
   0x5   :  { %p3279_p3 = por %p3278_p2, %p3277_p1 }
   0x7   :  { %p3280_p4 = pnand %p3279_p3, %p3273_p0 }
   0x9   :  { %3283 = shalt.err (!%p3280_p4)  }
   0xa   :  { %s3386_s19 = smov [#allocation4]  }
   0xb   :  { %12 = dma.vmem_to_smem %s10_s17, 16, %s3386_s19, [#allocation3] }
   0xc   :  { %3360 = dma.done.wait [#allocation3], 16 }
   0xd   :  { %3361 = vsyncadd [#allocation3], 4294967280 }
   0xe   :  { %14 = sfence }
   0xf   :  { %15 = vsyncpa [#allocation6], 0 }
  0x10   :  { %17 = vsyncpa [#allocation6 + $0x1], 0 }
  0x11   :  { %18 = vsyncpa [#allocation8], 0 }
  0x12   :  { %20 = vsyncpa [#allocation8 + $0x1], 0  ;;  %s3422_s20 = smov 0   ;;  %s3424_s0 = smov 0  }
  0x13   :  { %s3426_s21 = smov 0   ;;  %s3428_s22 = smov 0  }
  0x14 LB: > { %s3441_s23 = sadd.s32 4294967295, %s3384_s22   ;;  %s3444_s24 = sadd.s32 1, %s3384_s22   ;;  %s3384_s22 = sphi %s3428_s22, %s3900_s22   ;;  %s3380_s21 = sphi %s3426_s21, %s3899_s21   ;;  %s3376_s0 = sphi %s3424_s0, %s3898_s0   ;;  %s3372_s20 = sphi %s3422_s20, %s3897_s20  }
  0x15   : > { %s51_s25 = ssub.s32 %s3384_s22, %s3444_s24  ;;  %s54_s26 = sadd.s32 1, %s3380_s21 }
  0x16   : > { %p52_p5 = scmp.eq.s32.totalorder %s51_s25, 0  ;;  %p61_p6 = scmp.ne.s32.totalorder %s3380_s21, %s3376_s0 }
  0x17   : > { %p62_p7 = scmp.eq.s32.totalorder %s3384_s22, 0  ;;  %p67_p8 = scmp.ne.s32.totalorder %s3376_s0, %s3372_s20 }
  0x18   : > { %s3454_s27 = scalar_select %p52_p5, %s3380_s21, %s54_s26  }
  0x19   : > { %p63_p9 = por %p62_p7, %p61_p6  ;;  %p68_p10 = scmp.eq.s32.totalorder %s3441_s23, 0 }
  0x1a   : > { %p2841_p11 = scmp.lt.s32.totalorder %s3384_s22, 3  ;;  %s3463_s29 = sand.u32 1, %s3380_s21  }
  0x1b   : > { %p3458_p12 = por %p68_p10, %p67_p8  ;;  %s2376_s30 = sshll.u32 %s3463_s29, 11 }
  0x1c   : > { %s2797_s5 = sshll.u32 %s3384_s22, 15  ;;  %s145_s9 = scalar_lea.vmem [#allocation5], %s2376_s30 }
  0x1d   : > { %s3892_s28 = scalar_select %p3458_p12, 1, 0 }
  0x1e   : > { %s3470_s8 = scalar_lea.hbm %s3888_s2, %s2797_s5  ;;  %s153_s10 = sshll.u32 %s145_s9, 4  ;;  %s3472_s10 = int_to_ptr.vmem [resolvable:$true] %s153_s10 }
  0x1f   : > { %p3474_p13 = pnand %p2841_p11, %p63_p9  ;;  %s142_s12 = scalar_lea.sflag [#allocation6], %s3463_s29 }
  0x20   : > { %s3284_s13 = scalar_lea.hbm %s3470_s8, 32768  ;;  %s3289_s16 = scalar_lea.hbm %s3888_s2, 98304 }
  0x21   : > { %p3285_p1 = scmp.ne.s32.totalorder %s3470_s8, %s3284_s13  ;;  %p3286_p2 = pneg %p3474_p13 }
  0x22   : > { %p3290_p5 = scmp.lt.u32.totalorder %s3470_s8, %s3888_s2  ;;  %p3291_p6 = scmp.lt.u32.totalorder %s3289_s16, %s3284_s13 }
  0x23   : > { %p3287_p3 = pnand %p3286_p2, %p3285_p1  ;;  %p3293_p8 = scmp.lt.u32.totalorder %s3284_s13, %s3470_s8 }
  0x24   : > { %p3292_p7 = por %p3291_p6, %p3290_p5 }
  0x25   : > { %p3288_p4 = pneg %p3287_p3 }
  0x26   : > { %p3294_p9 = por %p3293_p8, %p3292_p7 }
  0x28   : > { %p3295_p10 = pnand %p3294_p9, %p3288_p4 }
  0x2a   : > { %3298 = shalt.err (!%p3295_p10)
}
  0x2b   : > { %s3299_s19 = scalar_lea.vmem %s3472_s10, 32768  ;;  %s3387_s20 = smov [#allocation5]  }
  0x2c   : > { %p3300_p11 = scmp.ne.s32.totalorder %s3472_s10, %s3299_s19  ;;  %s3304_s25 = sshll.u32 %s3387_s20, 4  ;;  %s3305_s25 = int_to_ptr.vmem [resolvable:$false] %s3304_s25 }
  0x2d   : > { %s3306_s26 = scalar_lea.vmem %s3305_s25, 65536  ;;  %p3307_p0 = scmp.lt.s32.totalorder %s3472_s10, %s3305_s25 }
  0x2e   : > { %p3302_p1 = pnand %p3300_p11, %p3286_p2  ;;  %p3308_p5 = scmp.lt.s32.totalorder %s3306_s26, %s3299_s19 }
  0x30   : > { %p3303_p3 = pneg %p3302_p1  ;;  %p3309_p6 = por %p3308_p5, %p3307_p0 }
  0x32   : > { %p3310_p7 = pnand %p3309_p6, %p3303_p3 }
  0x34   : > { %3313 = shalt.err (!%p3310_p7)
}
  0x35   : > { %s3388_s30 = smov 256   ;;  %s3389_s5 = smov 16  }
  0x36   : > { %2837 = dma.hbm_to_vmem [thread:$0]  (!%p3474_p13), %s3470_s8, 32768, %s3472_s10, %s142_s12, %s3388_s30, %s3388_s30, %s3389_s5  }
  0x37   : > { %p183_p4 = scmp.lt.s32.totalorder %s3384_s22, 4  ;;  %s2380_s6 = sshll.u32 %s3463_s29, 3 }
  0x38   : > { %s2799_s7 = sshll.u32 %s3384_s22, 7  ;;  %p3894_p0 = scmp.ge.s32.totalorder %s3384_s22, 1 }
  0x39   : > { %s3519_s15 = scalar_lea.hbm %s3889_s3, %s2799_s7  ;;  %s167_s16 = scalar_lea.vmem [#allocation7], %s2380_s6 }
  0x3a   : > { %p3512_p8 = pnand %p3894_p0, %p183_p4  ;;  %s175_s17 = sshll.u32 %s167_s16, 4  ;;  %s3521_s17 = int_to_ptr.vmem [resolvable:$true] %s175_s17 }
  0x3b   : > { %s164_s8 = scalar_lea.sflag [#allocation8], %s3463_s29  ;;  %s3314_s10 = scalar_lea.hbm %s3519_s15, 128 }
  0x3c   : > { %p3315_p9 = scmp.ne.s32.totalorder %s3519_s15, %s3314_s10  ;;  %s3319_s18 = scalar_lea.hbm %s3889_s3, 384 }
  0x3d   : > { %p3320_p1 = scmp.lt.u32.totalorder %s3519_s15, %s3889_s3  ;;  %p3321_p3 = scmp.lt.u32.totalorder %s3319_s18, %s3314_s10 }
  0x3e   : > { %p3317_p10 = pnand %p3315_p9, %p3286_p2  ;;  %p3323_p6 = scmp.lt.u32.totalorder %s3314_s10, %s3519_s15 }
  0x3f   : > { %p3322_p5 = por %p3321_p3, %p3320_p1 }
  0x40   : > { %p3318_p11 = pneg %p3317_p10 }
  0x41   : > { %p3324_p7 = por %p3323_p6, %p3322_p5 }
  0x43   : > { %p3325_p4 = pnand %p3324_p7, %p3318_p11 }
  0x45   : > { %3328 = shalt.err (!%p3325_p4)
}
  0x46   : > { %s3329_s25 = scalar_lea.vmem %s3521_s17, 128  ;;  %s3390_s26 = smov [#allocation7]  }
  0x47   : > { %p3330_p0 = scmp.ne.s32.totalorder %s3521_s17, %s3329_s25  ;;  %s3334_s30 = sshll.u32 %s3390_s26, 4  ;;  %s3335_s30 = int_to_ptr.vmem [resolvable:$false] %s3334_s30 }
  0x48   : > { %s3336_s5 = scalar_lea.vmem %s3335_s30, 256  ;;  %p3337_p12 = scmp.lt.s32.totalorder %s3521_s17, %s3335_s30 }
  0x49   : > { %p3332_p9 = pnand %p3330_p0, %p3286_p2  ;;  %p3338_p1 = scmp.lt.s32.totalorder %s3336_s5, %s3329_s25 }
  0x4b   : > { %p3333_p10 = pneg %p3332_p9  ;;  %p3339_p3 = por %p3338_p1, %p3337_p12 }
  0x4d   : > { %p3340_p5 = pnand %p3339_p3, %p3333_p10 }
  0x4f   : > { %3343 = shalt.err (!%p3340_p5)
}
  0x50   : > { %s3391_s6 = smov 64   ;;  %s3392_s7 = smov 4  }
  0x51   : > { %2840 = dma.hbm_to_vmem [thread:$0]  (!%p3474_p13), %s3519_s15, 128, %s3521_s17, %s164_s8, %s3391_s6, %s3391_s6, %s3392_s7  }
  0x52   : > { %187 = sbr.rel (%p3512_p8) target bundleno = 756 (0x2f4), region = 32  ;;  %s189_s13 = sand.u32 (!%p3512_p8), 1, %s3376_s0  }
  0x53   : > { %s2385_s14 = sshll.u32 (!%p3512_p8), %s189_s13, 11  ;;  %s190_s16 = scalar_lea.sflag (!%p3512_p8), [#allocation6], %s189_s13 }
  0x54   : > { %s3552_s10 = scalar_lea.vmem (!%p3512_p8), [#allocation5], %s2385_s14  ;;  %p3896_p12 = scmp.ne.s32.totalorder (!%p3512_p8), %s3892_s28, 0 }
  0x59   : > { %3363 = dma.done.wait (%p3896_p12), %s190_s16, 32768  }
  0x5a   : > { %3365 = vsyncadd (%p3896_p12), %s190_s16, 4294934528  ;;  %s2386_s22 = sshll.u32 %s189_s13, 3  ;;  %s199_s11 = scalar_lea.sflag [#allocation8], %s189_s13 }
  0x5b   : > { %s3558_s29 = scalar_lea.vmem [#allocation7], %s2386_s22 }
  0x5c   : > { %3367 = dma.done.wait (%p3896_p12), %s199_s11, 128  }
  0x5d   : > { %3369 = vsyncadd (%p3896_p12), %s199_s11, 4294967168  ;;  %p2387_p13 = scmp.ne.s32.totalorder %s3441_s23, 0 }
  0x5e   : > { %s231_s9 = sld [smem:[#allocation4]] (!%p2387_p13)  ;;  %s2388_s15 = sld [smem:[#allocation4 + $0x1]] (!%p2387_p13)  ;;  %v233_v0 = vlaneseq (!%p2387_p13)  ;;  %v265_v3 = vld [vmem:[%s3887_s1] sm:$0xf] (!%p2387_p13)  ;;  %v3393_v16 = vmov (!%p2387_p13), 0.0  }
  0x5f   : > { %230 = sbr.rel (%p2387_p13) target bundleno = 114 (0x72), region = 44 }
  0x60   : > { %v234_v1 = vand.u32 (!%p2387_p13), 127, %v233_v0  ;;  %v239_v2 = vshrl.u32 (!%p2387_p13), %v233_v0, 7 }
  0x62   : > { %v235_v4 = vadd.s32 (!%p2387_p13), 128, %v234_v1  ;;  %v269_v5 = vsub.s32 (!%p2387_p13), 0, %v239_v2  ;;  %v273_v6 = vsub.s32 (!%p2387_p13), 1, %v239_v2  ;;  %v236_v7 = vadd.s32 (!%p2387_p13), 256, %v234_v1 }
  0x63   : > { %v237_v8 = vadd.s32 (!%p2387_p13), 384, %v234_v1  ;;  %v277_v9 = vsub.s32 (!%p2387_p13), 2, %v239_v2  ;;  %v281_v11 = vsub.s32 (!%p2387_p13), 3, %v239_v2  ;;  %vm264_vm10 = vcmp.eq.s32.totalorder (!%p2387_p13), %v239_v2, 0 }
  0x64   : > { %s240_s28 = sadd.s32 (!%p2387_p13), 384, %s231_s9  ;;  %s246_s12 = sadd.s32 (!%p2387_p13), 400, %s2388_s15  ;;  %v270_v10 = vrot.slane (!%p2387_p13), %v265_v3, %v269_v5  ;;  %v274_v14 = vrot.slane (!%p2387_p13), %v265_v3, %v273_v6 }
  0x65   : > { %v241_v12 = vstv (!%p2387_p13), %s240_s28  ;;  %v247_v13 = vstv (!%p2387_p13), %s246_s12  ;;  %v278_v15 = vrot.slane (!%p2387_p13), %v265_v3, %v277_v9  ;;  %v282_v18 = vrot.slane (!%p2387_p13), %v265_v3, %v281_v11 }
  0x66   : > { %vm242_vm0 = vcmp.eq.s32.totalorder %v234_v1, %v241_v12  ;;  %vm243_vm1 = vcmp.eq.s32.totalorder %v235_v4, %v241_v12  ;;  %vm248_vm2 = vcmp.eq.s32.totalorder %v234_v1, %v247_v13  ;;  %vm249_vm3 = vcmp.eq.s32.totalorder %v235_v4, %v247_v13 }
  0x67   : > { %vm252_vm4 = vmor %vm242_vm0, %vm248_vm2  ;;  %vm244_vm5 = vcmp.eq.s32.totalorder %v236_v7, %v241_v12  ;;  %vm245_vm6 = vcmp.eq.s32.totalorder %v237_v8, %v241_v12  ;;  %vm250_vm7 = vcmp.eq.s32.totalorder %v236_v7, %v247_v13  ;;  %vm251_vm8 = vcmp.eq.s32.totalorder %v237_v8, %v247_v13 }
  0x68   : > { %vm253_vm9 = vmor %vm243_vm1, %vm249_vm3  ;;  %v2389_v17 = vsel %vm252_vm4, 1.0, %v3393_v16 }
  0x69   : > { %v2390_v19 = vsel %vm253_vm9, 1.0, %v3393_v16  ;;  %v287_v20 = vadd.f32 %v2389_v17, %v270_v10  ;;  %vm254_vm11 = vmor %vm244_vm5, %vm250_vm7 }
  0x6a   : > { %v288_v21 = vadd.f32 %v2390_v19, %v274_v14  ;;  %vm255_vm12 = vmor %vm245_vm6, %vm251_vm8  ;;  %v2391_v22 = vsel %vm254_vm11, 1.0, %v3393_v16 }
  0x6b   : > { %v291_v23 = vsel %vm264_vm10, %v287_v20, 0.0  ;;  %v2392_v24 = vsel %vm255_vm12, 1.0, %v3393_v16  ;;  %v289_v25 = vadd.f32 %v2391_v22, %v278_v15 }
  0x6c   : > { %v292_v26 = vsel %vm264_vm10, %v288_v21, 0.0  ;;  %v290_v27 = vadd.f32 %v2392_v24, %v282_v18 }
  0x6d   : > { %v2800_v28 = vpack.c.bf16 %v292_v26, %v291_v23  ;;  %v293_v29 = vsel %vm264_vm10, %v289_v25, 0.0 }
  0x6e   : > { %v294_v30 = vsel %vm264_vm10, %v290_v27, 0.0 }
  0x6f   : > { %311 = vst [vmem:[#allocation2] sm:$0xff] %v2800_v28  ;;  %v2801_v31 = vpack.c.bf16 %v294_v30, %v293_v29 }
  0x71   : > { %312 = vst [vmem:[#allocation2 + $0x8] sm:$0xff] %v2801_v31 }
  0x72 PF: > { %v2880_v32 = vld [vmem:[%s3552_s10 + $0x4] ss:$16 sps:$4 sm:$0xff]   ;;  %v2882_v33 = vld [vmem:[%s3552_s10 + $0xc] ss:$16 sps:$4 sm:$0xff]   ;;  %v2884_v34 = vld [vmem:[%s3552_s10] ss:$16 sps:$4 sm:$0xff]  }
  0x73   : > { %1119 = vmatprep.subr.bf16.mxu0 %v2880_v32  ;;  %v2885_v35 = vld [vmem:[%s3552_s10 + $0x8] ss:$16 sps:$4 sm:$0xff]   ;;  %1201 = vmatprep.subr.bf16.mxu1 %v2882_v33  ;;  %v2886_v36 = vld [vmem:[%s3552_s10 + $0x24] ss:$16 sps:$4 sm:$0xff]   ;;  %v2888_v37 = vld [vmem:[%s3552_s10 + $0x2c] ss:$16 sps:$4 sm:$0xff]  }
  0x74   : > { %1120 = vmatpush1.bf16.msra.mxu0 %v2884_v34  ;;  %1202 = vmatpush1.bf16.msra.mxu1 %v2885_v35  ;;  %v2890_v38 = vld [vmem:[%s3552_s10 + $0x20] ss:$16 sps:$4 sm:$0xff]   ;;  %v2891_v39 = vld [vmem:[%s3552_s10 + $0x28] ss:$16 sps:$4 sm:$0xff]   ;;  %v2892_v40 = vld [vmem:[%s3552_s10 + $0x44] ss:$16 sps:$4 sm:$0xff]  }
  0x75   : > { %1121 = vmatprep.subr.bf16.mxu0 %v2886_v36  ;;  %1203 = vmatprep.subr.bf16.mxu1 %v2888_v37  ;;  %v2894_v41 = vld [vmem:[%s3552_s10 + $0x4c] ss:$16 sps:$4 sm:$0xff]   ;;  %v2896_v42 = vld [vmem:[%s3552_s10 + $0x40] ss:$16 sps:$4 sm:$0xff]   ;;  %v2897_v43 = vld [vmem:[%s3552_s10 + $0x48] ss:$16 sps:$4 sm:$0xff]  }
  0x76   : > { %v2898_v44 = vld [vmem:[%s3552_s10 + $0x64] ss:$16 sps:$4 sm:$0xff]   ;;  %v2900_v45 = vld [vmem:[%s3552_s10 + $0x6c] ss:$16 sps:$4 sm:$0xff]   ;;  %v2902_v46 = vld [vmem:[%s3552_s10 + $0x60] ss:$16 sps:$4 sm:$0xff]  }
  0x77   : > { %v2903_v47 = vld [vmem:[%s3552_s10 + $0x68] ss:$16 sps:$4 sm:$0xff]   ;;  %v2904_v48 = vld [vmem:[%s3552_s10 + $0x84] ss:$16 sps:$4 sm:$0xff]   ;;  %v2906_v49 = vld [vmem:[%s3552_s10 + $0x8c] ss:$16 sps:$4 sm:$0xff]  }
  0x78   : > { %1122 = vmatpush1.bf16.msra.mxu0 %v2890_v38  ;;  %1204 = vmatpush1.bf16.msra.mxu1 %v2891_v39  ;;  %v2908_v50 = vld [vmem:[%s3552_s10 + $0x80] ss:$16 sps:$4 sm:$0xff]   ;;  %v2909_v51 = vld [vmem:[%s3552_s10 + $0x88] ss:$16 sps:$4 sm:$0xff]   ;;  %v2910_v52 = vld [vmem:[%s3552_s10 + $0xa4] ss:$16 sps:$4 sm:$0xff]  }
  0x79   : > { %1123 = vmatprep.subr.bf16.mxu0 %v2892_v40  ;;  %1205 = vmatprep.subr.bf16.mxu1 %v2894_v41  ;;  %v2912_v53 = vld [vmem:[%s3552_s10 + $0xac] ss:$16 sps:$4 sm:$0xff]   ;;  %v2914_v54 = vld [vmem:[%s3552_s10 + $0xa0] ss:$16 sps:$4 sm:$0xff]   ;;  %v2915_v55 = vld [vmem:[%s3552_s10 + $0xa8] ss:$16 sps:$4 sm:$0xff]  }
  0x7a   : > { %v2916_v56 = vld [vmem:[%s3552_s10 + $0xc4] ss:$16 sps:$4 sm:$0xff]   ;;  %v2918_v57 = vld [vmem:[%s3552_s10 + $0xcc] ss:$16 sps:$4 sm:$0xff]   ;;  %v2920_v58 = vld [vmem:[%s3552_s10 + $0xc0] ss:$16 sps:$4 sm:$0xff]  }
  0x7b   : > { %v2921_v59 = vld [vmem:[%s3552_s10 + $0xc8] ss:$16 sps:$4 sm:$0xff]   ;;  %v2922_v60 = vld [vmem:[%s3552_s10 + $0xe4] ss:$16 sps:$4 sm:$0xff]   ;;  %v2924_v61 = vld [vmem:[%s3552_s10 + $0xec] ss:$16 sps:$4 sm:$0xff]  }
  0x7c   : > { %1124 = vmatpush1.bf16.msra.mxu0 %v2896_v42  ;;  %1206 = vmatpush1.bf16.msra.mxu1 %v2897_v43  ;;  %v2926_v62 = vld [vmem:[%s3552_s10 + $0xe0] ss:$16 sps:$4 sm:$0xff]   ;;  %v2927_v63 = vld [vmem:[%s3552_s10 + $0xe8] ss:$16 sps:$4 sm:$0xff]   ;;  %v2928_v0 = vld [vmem:[%s3552_s10 + $0x104] ss:$16 sps:$4 sm:$0xff]  }
  0x7d   : > { %1125 = vmatprep.subr.bf16.mxu0 %v2898_v44  ;;  %1207 = vmatprep.subr.bf16.mxu1 %v2900_v45  ;;  %v2930_v1 = vld [vmem:[%s3552_s10 + $0x10c] ss:$16 sps:$4 sm:$0xff]   ;;  %v2932_v2 = vld [vmem:[%s3552_s10 + $0x100] ss:$16 sps:$4 sm:$0xff]   ;;  %v2933_v3 = vld [vmem:[%s3552_s10 + $0x108] ss:$16 sps:$4 sm:$0xff]  }
  0x7e   : > { %v2934_v4 = vld [vmem:[%s3552_s10 + $0x124] ss:$16 sps:$4 sm:$0xff]   ;;  %v2936_v5 = vld [vmem:[%s3552_s10 + $0x12c] ss:$16 sps:$4 sm:$0xff]   ;;  %v2938_v6 = vld [vmem:[%s3552_s10 + $0x120] ss:$16 sps:$4 sm:$0xff]  }
  0x7f   : > { %v2939_v7 = vld [vmem:[%s3552_s10 + $0x128] ss:$16 sps:$4 sm:$0xff]   ;;  %v2940_v8 = vld [vmem:[%s3552_s10 + $0x144] ss:$16 sps:$4 sm:$0xff]   ;;  %v2942_v9 = vld [vmem:[%s3552_s10 + $0x14c] ss:$16 sps:$4 sm:$0xff]  }
  0x80   : > { %1126 = vmatpush1.bf16.msra.mxu0 %v2902_v46  ;;  %1208 = vmatpush1.bf16.msra.mxu1 %v2903_v47  ;;  %v2944_v10 = vld [vmem:[%s3552_s10 + $0x140] ss:$16 sps:$4 sm:$0xff]   ;;  %v2945_v11 = vld [vmem:[%s3552_s10 + $0x148] ss:$16 sps:$4 sm:$0xff]   ;;  %v2946_v12 = vld [vmem:[%s3552_s10 + $0x164] ss:$16 sps:$4 sm:$0xff]  }
  0x81   : > { %1127 = vmatprep.subr.bf16.mxu0 %v2904_v48  ;;  %1209 = vmatprep.subr.bf16.mxu1 %v2906_v49  ;;  %v2948_v13 = vld [vmem:[%s3552_s10 + $0x16c] ss:$16 sps:$4 sm:$0xff]   ;;  %v313_v14 = vld [vmem:[#allocation2] sm:$0xff]  ;;  %v2951_v17 = vld [vmem:[%s3552_s10 + $0x168] ss:$16 sps:$4 sm:$0xff]   ;;  %p2790_p2 = scmp.ge.s32.totalorder %s3441_s23, 2 }
  0x82   : > { %v2950_v15 = vld [vmem:[%s3552_s10 + $0x160] ss:$16 sps:$4 sm:$0xff]   ;;  %v2396_v16 = vcombine.high %v313_v14, %v313_v14  ;;  %v2952_v18 = vld [vmem:[%s3552_s10 + $0x184] ss:$16 sps:$4 sm:$0xff]   ;;  %v2954_v19 = vld [vmem:[%s3552_s10 + $0x18c] ss:$16 sps:$4 sm:$0xff]   ;;  %v2395_v37 = vcombine.low %v313_v14, %v313_v14 }
  0x83   : > { %v2956_v20 = vld [vmem:[%s3552_s10 + $0x180] ss:$16 sps:$4 sm:$0xff]   ;;  %v2957_v21 = vld [vmem:[%s3552_s10 + $0x188] ss:$16 sps:$4 sm:$0xff]   ;;  %v2958_v22 = vld [vmem:[%s3552_s10 + $0x1a4] ss:$16 sps:$4 sm:$0xff]  }
  0x84   : > { %1128 = vmatpush1.bf16.msra.mxu0 %v2908_v50  ;;  %1210 = vmatpush1.bf16.msra.mxu1 %v2909_v51  ;;  %v2960_v23 = vld [vmem:[%s3552_s10 + $0x1ac] ss:$16 sps:$4 sm:$0xff]   ;;  %v2962_v24 = vld [vmem:[%s3552_s10 + $0x1a0] ss:$16 sps:$4 sm:$0xff]   ;;  %v2963_v25 = vld [vmem:[%s3552_s10 + $0x1a8] ss:$16 sps:$4 sm:$0xff]  }
  0x85   : > { %1129 = vmatprep.subr.bf16.mxu0 %v2910_v52  ;;  %1211 = vmatprep.subr.bf16.mxu1 %v2912_v53  ;;  %v2964_v26 = vld [vmem:[%s3552_s10 + $0x1c4] ss:$16 sps:$4 sm:$0xff]   ;;  %v2966_v27 = vld [vmem:[%s3552_s10 + $0x1cc] ss:$16 sps:$4 sm:$0xff]   ;;  %v2968_v28 = vld [vmem:[%s3552_s10 + $0x1c0] ss:$16 sps:$4 sm:$0xff]  }
  0x86   : > { %1151 = vmatprep.mubr.bf16.mxu0 %v2396_v16  ;;  %1233 = vmatprep.mubr.bf16.mxu1 %v2396_v16  ;;  %v2969_v29 = vld [vmem:[%s3552_s10 + $0x1c8] ss:$16 sps:$4 sm:$0xff]   ;;  %v2970_v30 = vld [vmem:[%s3552_s10 + $0x1e4] ss:$16 sps:$4 sm:$0xff]   ;;  %v2972_v31 = vld [vmem:[%s3552_s10 + $0x1ec] ss:$16 sps:$4 sm:$0xff]  }
  0x87   : > { %v2974_v32 = vld [vmem:[%s3552_s10 + $0x1e0] ss:$16 sps:$4 sm:$0xff]   ;;  %v2975_v33 = vld [vmem:[%s3552_s10 + $0x1e8] ss:$16 sps:$4 sm:$0xff]   ;;  %v2979_v34 = vld [vmem:[%s3552_s10 + $0x204] ss:$16 sps:$4 sm:$0xff]  }
  0x88   : > { %1130 = vmatpush1.bf16.msra.mxu0 %v2914_v54  ;;  %1212 = vmatpush1.bf16.msra.mxu1 %v2915_v55  ;;  %v2982_v35 = vld [vmem:[%s3552_s10 + $0x20c] ss:$16 sps:$4 sm:$0xff]   ;;  %v2977_v36 = vld [vmem:[%s3552_s10 + $0x200] ss:$16 sps:$4 sm:$0xff]   ;;  %v2980_v38 = vld [vmem:[%s3552_s10 + $0x208] ss:$16 sps:$4 sm:$0xff]  }
  0x89   : > { %1131 = vmatprep.subr.bf16.mxu0 %v2916_v56  ;;  %1213 = vmatprep.subr.bf16.mxu1 %v2918_v57  ;;  %v2986_v39 = vld [vmem:[%s3552_s10 + $0x224] ss:$16 sps:$4 sm:$0xff]   ;;  %v2989_v40 = vld [vmem:[%s3552_s10 + $0x22c] ss:$16 sps:$4 sm:$0xff]   ;;  %v2984_v41 = vld [vmem:[%s3552_s10 + $0x220] ss:$16 sps:$4 sm:$0xff]  }
  0x8a   : > { %v2987_v42 = vld [vmem:[%s3552_s10 + $0x228] ss:$16 sps:$4 sm:$0xff]   ;;  %v2992_v43 = vld [vmem:[%s3552_s10 + $0x244] ss:$16 sps:$4 sm:$0xff]   ;;  %v2995_v44 = vld [vmem:[%s3552_s10 + $0x24c] ss:$16 sps:$4 sm:$0xff]  }
  0x8b   : > { %v2990_v45 = vld [vmem:[%s3552_s10 + $0x240] ss:$16 sps:$4 sm:$0xff]   ;;  %v2993_v46 = vld [vmem:[%s3552_s10 + $0x248] ss:$16 sps:$4 sm:$0xff]   ;;  %v2998_v47 = vld [vmem:[%s3552_s10 + $0x264] ss:$16 sps:$4 sm:$0xff]  }
  0x8c   : > { %1132 = vmatpush1.bf16.msra.mxu0 %v2920_v58  ;;  %1214 = vmatpush1.bf16.msra.mxu1 %v2921_v59  ;;  %v3001_v48 = vld [vmem:[%s3552_s10 + $0x26c] ss:$16 sps:$4 sm:$0xff]   ;;  %v2996_v49 = vld [vmem:[%s3552_s10 + $0x260] ss:$16 sps:$4 sm:$0xff]   ;;  %v2999_v50 = vld [vmem:[%s3552_s10 + $0x268] ss:$16 sps:$4 sm:$0xff]  }
  0x8d   : > { %1133 = vmatprep.subr.bf16.mxu0 %v2922_v60  ;;  %1215 = vmatprep.subr.bf16.mxu1 %v2924_v61  ;;  %v3004_v51 = vld [vmem:[%s3552_s10 + $0x284] ss:$16 sps:$4 sm:$0xff]   ;;  %v3007_v52 = vld [vmem:[%s3552_s10 + $0x28c] ss:$16 sps:$4 sm:$0xff]   ;;  %v3002_v53 = vld [vmem:[%s3552_s10 + $0x280] ss:$16 sps:$4 sm:$0xff]  }
  0x8e   : > { %v3005_v54 = vld [vmem:[%s3552_s10 + $0x288] ss:$16 sps:$4 sm:$0xff]   ;;  %v3010_v55 = vld [vmem:[%s3552_s10 + $0x2a4] ss:$16 sps:$4 sm:$0xff]   ;;  %v3013_v56 = vld [vmem:[%s3552_s10 + $0x2ac] ss:$16 sps:$4 sm:$0xff]  }
  0x8f   : > { %v3008_v57 = vld [vmem:[%s3552_s10 + $0x2a0] ss:$16 sps:$4 sm:$0xff]   ;;  %v3011_v58 = vld [vmem:[%s3552_s10 + $0x2a8] ss:$16 sps:$4 sm:$0xff]   ;;  %v3016_v59 = vld [vmem:[%s3552_s10 + $0x2c4] ss:$16 sps:$4 sm:$0xff]  }
  0x90   : > { %1134 = vmatpush1.bf16.msra.mxu0 %v2926_v62  ;;  %1216 = vmatpush1.bf16.msra.mxu1 %v2927_v63  ;;  %v3019_v60 = vld [vmem:[%s3552_s10 + $0x2cc] ss:$16 sps:$4 sm:$0xff]   ;;  %v3014_v63 = vld [vmem:[%s3552_s10 + $0x2c0] ss:$16 sps:$4 sm:$0xff]   ;;  %v3041_v16 = vld [vmem:[%s3552_s10 + $0x348] ss:$16 sps:$4 sm:$0xff]  }
  0x91   : > { %1135 = vmatprep.subr.bf16.mxu0 %v2928_v0  ;;  %1217 = vmatprep.subr.bf16.mxu1 %v2930_v1  ;;  %v3658_v61 = vld [vmem:[#allocation2 + $0x8] sm:$0xff]  ;;  %v3022_v1 = vld [vmem:[%s3552_s10 + $0x2e4] ss:$16 sps:$4 sm:$0xff]  }
  0x92   : > { %v2398_v62 = vcombine.high %v3658_v61, %v3658_v61  ;;  %v3017_v0 = vld [vmem:[%s3552_s10 + $0x2c8] ss:$16 sps:$4 sm:$0xff]   ;;  %v3043_v14 = vld [vmem:[%s3552_s10 + $0x34c] ss:$16 sps:$4 sm:$0xff]  }
  0x94   : > { %1136 = vmatpush1.bf16.msra.mxu0 %v2932_v2  ;;  %1218 = vmatpush1.bf16.msra.mxu1 %v2933_v3  ;;  %v3025_v2 = vld [vmem:[%s3552_s10 + $0x2ec] ss:$16 sps:$4 sm:$0xff]   ;;  %v3020_v3 = vld [vmem:[%s3552_s10 + $0x2e0] ss:$16 sps:$4 sm:$0xff]  }
  0x95   : > { %1137 = vmatprep.subr.bf16.mxu0 %v2934_v4  ;;  %1219 = vmatprep.subr.bf16.mxu1 %v2936_v5  ;;  %v3023_v4 = vld [vmem:[%s3552_s10 + $0x2e8] ss:$16 sps:$4 sm:$0xff]   ;;  %v3028_v5 = vld [vmem:[%s3552_s10 + $0x304] ss:$16 sps:$4 sm:$0xff]  }
  0x98   : > { %1138 = vmatpush1.bf16.msra.mxu0 %v2938_v6  ;;  %1220 = vmatpush1.bf16.msra.mxu1 %v2939_v7  ;;  %v3031_v6 = vld [vmem:[%s3552_s10 + $0x30c] ss:$16 sps:$4 sm:$0xff]   ;;  %v3026_v7 = vld [vmem:[%s3552_s10 + $0x300] ss:$16 sps:$4 sm:$0xff]  }
  0x99   : > { %1139 = vmatprep.subr.bf16.mxu0 %v2940_v8  ;;  %1221 = vmatprep.subr.bf16.mxu1 %v2942_v9  ;;  %v3029_v8 = vld [vmem:[%s3552_s10 + $0x308] ss:$16 sps:$4 sm:$0xff]   ;;  %v3034_v9 = vld [vmem:[%s3552_s10 + $0x324] ss:$16 sps:$4 sm:$0xff]  }
  0x9c   : > { %1140 = vmatpush1.bf16.msra.mxu0 %v2944_v10  ;;  %1222 = vmatpush1.bf16.msra.mxu1 %v2945_v11  ;;  %v3037_v10 = vld [vmem:[%s3552_s10 + $0x32c] ss:$16 sps:$4 sm:$0xff]   ;;  %v3032_v11 = vld [vmem:[%s3552_s10 + $0x320] ss:$16 sps:$4 sm:$0xff]  }
  0x9d   : > { %1141 = vmatprep.subr.bf16.mxu0 %v2946_v12  ;;  %1223 = vmatprep.subr.bf16.mxu1 %v2948_v13  ;;  %v3035_v12 = vld [vmem:[%s3552_s10 + $0x328] ss:$16 sps:$4 sm:$0xff]   ;;  %v3040_v13 = vld [vmem:[%s3552_s10 + $0x344] ss:$16 sps:$4 sm:$0xff]  }
  0xa0   : > { %1142 = vmatpush1.bf16.msra.mxu0 %v2950_v15  ;;  %1224 = vmatpush1.bf16.msra.mxu1 %v2951_v17  ;;  %v3038_v15 = vld [vmem:[%s3552_s10 + $0x340] ss:$16 sps:$4 sm:$0xff]   ;;  %v3046_v17 = vld [vmem:[%s3552_s10 + $0x364] ss:$16 sps:$4 sm:$0xff]  }
  0xa1   : > { %1143 = vmatprep.subr.bf16.mxu0 %v2952_v18  ;;  %1225 = vmatprep.subr.bf16.mxu1 %v2954_v19  ;;  %v3049_v18 = vld [vmem:[%s3552_s10 + $0x36c] ss:$16 sps:$4 sm:$0xff]   ;;  %v3044_v19 = vld [vmem:[%s3552_s10 + $0x360] ss:$16 sps:$4 sm:$0xff]  }
  0xa4   : > { %1144 = vmatpush1.bf16.msra.mxu0 %v2956_v20  ;;  %1226 = vmatpush1.bf16.msra.mxu1 %v2957_v21  ;;  %v3047_v20 = vld [vmem:[%s3552_s10 + $0x368] ss:$16 sps:$4 sm:$0xff]   ;;  %v3052_v21 = vld [vmem:[%s3552_s10 + $0x384] ss:$16 sps:$4 sm:$0xff]  }
  0xa5   : > { %1145 = vmatprep.subr.bf16.mxu0 %v2958_v22  ;;  %1227 = vmatprep.subr.bf16.mxu1 %v2960_v23  ;;  %v3055_v22 = vld [vmem:[%s3552_s10 + $0x38c] ss:$16 sps:$4 sm:$0xff]   ;;  %v3050_v23 = vld [vmem:[%s3552_s10 + $0x380] ss:$16 sps:$4 sm:$0xff]  }
  0xa8   : > { %1146 = vmatpush1.bf16.msra.mxu0 %v2962_v24  ;;  %1228 = vmatpush1.bf16.msra.mxu1 %v2963_v25  ;;  %v3053_v24 = vld [vmem:[%s3552_s10 + $0x388] ss:$16 sps:$4 sm:$0xff]   ;;  %v3058_v25 = vld [vmem:[%s3552_s10 + $0x3a4] ss:$16 sps:$4 sm:$0xff]  }
  0xa9   : > { %1147 = vmatprep.subr.bf16.mxu0 %v2964_v26  ;;  %1229 = vmatprep.subr.bf16.mxu1 %v2966_v27  ;;  %v3061_v26 = vld [vmem:[%s3552_s10 + $0x3ac] ss:$16 sps:$4 sm:$0xff]   ;;  %v3056_v27 = vld [vmem:[%s3552_s10 + $0x3a0] ss:$16 sps:$4 sm:$0xff]  }
  0xac   : > { %1148 = vmatpush1.bf16.msra.mxu0 %v2968_v28  ;;  %1230 = vmatpush1.bf16.msra.mxu1 %v2969_v29  ;;  %v3059_v28 = vld [vmem:[%s3552_s10 + $0x3a8] ss:$16 sps:$4 sm:$0xff]   ;;  %v3064_v29 = vld [vmem:[%s3552_s10 + $0x3c4] ss:$16 sps:$4 sm:$0xff]  }
  0xad   : > { %1149 = vmatprep.subr.bf16.mxu0 %v2970_v30  ;;  %1231 = vmatprep.subr.bf16.mxu1 %v2972_v31  ;;  %v3067_v30 = vld [vmem:[%s3552_s10 + $0x3cc] ss:$16 sps:$4 sm:$0xff]   ;;  %v3062_v31 = vld [vmem:[%s3552_s10 + $0x3c0] ss:$16 sps:$4 sm:$0xff]  }
  0xb0   : > { %1150 = vmatpush1.bf16.msra.mxu0 %v2974_v32  ;;  %1232 = vmatpush1.bf16.msra.mxu1 %v2975_v33  ;;  %v3065_v32 = vld [vmem:[%s3552_s10 + $0x3c8] ss:$16 sps:$4 sm:$0xff]   ;;  %v3070_v33 = vld [vmem:[%s3552_s10 + $0x3e4] ss:$16 sps:$4 sm:$0xff]  }
  0xb1   : > { %1160 = vmatprep.subr.bf16.mxu0 %v2979_v34  ;;  %1242 = vmatprep.subr.bf16.mxu1 %v2982_v35  ;;  %v3073_v34 = vld [vmem:[%s3552_s10 + $0x3ec] ss:$16 sps:$4 sm:$0xff]   ;;  %v3068_v35 = vld [vmem:[%s3552_s10 + $0x3e0] ss:$16 sps:$4 sm:$0xff]  }
  0xb3   : > { %1152 = vmatmul.mubr.bf16.vlgmr.msra.gmra.mrb[0].mxu0 %v2395_v37  ;;  %1234 = vmatmul.mubr.bf16.vlgmr.msra.gmra.mrb[0].mxu1 %v2395_v37  ;;  %v3078_v37 = vld [vmem:[%s3552_s10 + $0x404] ss:$16 sps:$4 sm:$0xff]  }
  0xb4   : > { %1161 = vmatpush1.bf16.msra.mxu0 %v2977_v36  ;;  %1243 = vmatpush1.bf16.msra.mxu1 %v2980_v38  ;;  %v3071_v36 = vld [vmem:[%s3552_s10 + $0x3e8] ss:$16 sps:$4 sm:$0xff]   ;;  %v3081_v38 = vld [vmem:[%s3552_s10 + $0x40c] ss:$16 sps:$4 sm:$0xff]  }
  0xb5   : > { %1162 = vmatprep.subr.bf16.mxu0 %v2986_v39  ;;  %1244 = vmatprep.subr.bf16.mxu1 %v2989_v40  ;;  %v3076_v39 = vld [vmem:[%s3552_s10 + $0x400] ss:$16 sps:$4 sm:$0xff]   ;;  %v3079_v40 = vld [vmem:[%s3552_s10 + $0x408] ss:$16 sps:$4 sm:$0xff]  }
  0xb6   : > { %1192 = vmatprep.mubr.bf16.mxu0 %v2398_v62  ;;  %1274 = vmatprep.mubr.bf16.mxu1 %v2398_v62  ;;  %v3114_v62 = vld [vmem:[%s3552_s10 + $0x4c4] ss:$16 sps:$4 sm:$0xff]  }
  0xb8   : > { %1163 = vmatpush1.bf16.msra.mxu0 %v2984_v41  ;;  %1245 = vmatpush1.bf16.msra.mxu1 %v2987_v42  ;;  %v2397_v41 = vcombine.low %v3658_v61, %v3658_v61  ;;  %v3084_v42 = vld [vmem:[%s3552_s10 + $0x424] ss:$16 sps:$4 sm:$0xff]   ;;  %v3109_v61 = vld [vmem:[%s3552_s10 + $0x4a8] ss:$16 sps:$4 sm:$0xff]  }
  0xb9   : > { %1164 = vmatprep.subr.bf16.mxu0 %v2992_v43  ;;  %1246 = vmatprep.subr.bf16.mxu1 %v2995_v44  ;;  %v3087_v43 = vld [vmem:[%s3552_s10 + $0x42c] ss:$16 sps:$4 sm:$0xff]   ;;  %v3082_v44 = vld [vmem:[%s3552_s10 + $0x420] ss:$16 sps:$4 sm:$0xff]  }
  0xbc   : > { %1165 = vmatpush1.bf16.msra.mxu0 %v2990_v45  ;;  %1247 = vmatpush1.bf16.msra.mxu1 %v2993_v46  ;;  %v3085_v45 = vld [vmem:[%s3552_s10 + $0x428] ss:$16 sps:$4 sm:$0xff]   ;;  %v3090_v46 = vld [vmem:[%s3552_s10 + $0x444] ss:$16 sps:$4 sm:$0xff]  }
  0xbd   : > { %1166 = vmatprep.subr.bf16.mxu0 %v2998_v47  ;;  %1248 = vmatprep.subr.bf16.mxu1 %v3001_v48  ;;  %v3093_v47 = vld [vmem:[%s3552_s10 + $0x44c] ss:$16 sps:$4 sm:$0xff]   ;;  %v3088_v48 = vld [vmem:[%s3552_s10 + $0x440] ss:$16 sps:$4 sm:$0xff]  }
  0xc0   : > { %1167 = vmatpush1.bf16.msra.mxu0 %v2996_v49  ;;  %1249 = vmatpush1.bf16.msra.mxu1 %v2999_v50  ;;  %v3091_v49 = vld [vmem:[%s3552_s10 + $0x448] ss:$16 sps:$4 sm:$0xff]   ;;  %v3096_v50 = vld [vmem:[%s3552_s10 + $0x464] ss:$16 sps:$4 sm:$0xff]  }
  0xc1   : > { %1168 = vmatprep.subr.bf16.mxu0 %v3004_v51  ;;  %1250 = vmatprep.subr.bf16.mxu1 %v3007_v52  ;;  %v3099_v51 = vld [vmem:[%s3552_s10 + $0x46c] ss:$16 sps:$4 sm:$0xff]   ;;  %v3094_v52 = vld [vmem:[%s3552_s10 + $0x460] ss:$16 sps:$4 sm:$0xff]  }
  0xc4   : > { %1169 = vmatpush1.bf16.msra.mxu0 %v3002_v53  ;;  %1251 = vmatpush1.bf16.msra.mxu1 %v3005_v54  ;;  %v3097_v53 = vld [vmem:[%s3552_s10 + $0x468] ss:$16 sps:$4 sm:$0xff]   ;;  %v3102_v54 = vld [vmem:[%s3552_s10 + $0x484] ss:$16 sps:$4 sm:$0xff]  }
  0xc5   : > { %1170 = vmatprep.subr.bf16.mxu0 %v3010_v55  ;;  %1252 = vmatprep.subr.bf16.mxu1 %v3013_v56  ;;  %v3105_v55 = vld [vmem:[%s3552_s10 + $0x48c] ss:$16 sps:$4 sm:$0xff]   ;;  %v3100_v56 = vld [vmem:[%s3552_s10 + $0x480] ss:$16 sps:$4 sm:$0xff]  }
  0xc8   : > { %1171 = vmatpush1.bf16.msra.mxu0 %v3008_v57  ;;  %1253 = vmatpush1.bf16.msra.mxu1 %v3011_v58  ;;  %v3103_v57 = vld [vmem:[%s3552_s10 + $0x488] ss:$16 sps:$4 sm:$0xff]   ;;  %v3108_v58 = vld [vmem:[%s3552_s10 + $0x4a4] ss:$16 sps:$4 sm:$0xff]  }
  0xc9   : > { %1172 = vmatprep.subr.bf16.mxu0 %v3016_v59  ;;  %1254 = vmatprep.subr.bf16.mxu1 %v3019_v60  ;;  %v3111_v59 = vld [vmem:[%s3552_s10 + $0x4ac] ss:$16 sps:$4 sm:$0xff]   ;;  %v3106_v60 = vld [vmem:[%s3552_s10 + $0x4a0] ss:$16 sps:$4 sm:$0xff]  }
  0xcc   : > { %1173 = vmatpush1.bf16.msra.mxu0 %v3014_v63  ;;  %1255 = vmatpush1.bf16.msra.mxu1 %v3017_v0  ;;  %v3117_v63 = vld [vmem:[%s3552_s10 + $0x4cc] ss:$16 sps:$4 sm:$0xff]   ;;  %v3112_v0 = vld [vmem:[%s3552_s10 + $0x4c0] ss:$16 sps:$4 sm:$0xff]  }
  0xcd   : > { %1174 = vmatprep.subr.bf16.mxu0 %v3022_v1  ;;  %1256 = vmatprep.subr.bf16.mxu1 %v3025_v2  ;;  %v3115_v1 = vld [vmem:[%s3552_s10 + $0x4c8] ss:$16 sps:$4 sm:$0xff]   ;;  %v3120_v2 = vld [vmem:[%s3552_s10 + $0x4e4] ss:$16 sps:$4 sm:$0xff]  }
  0xd0   : > { %1175 = vmatpush1.bf16.msra.mxu0 %v3020_v3  ;;  %1257 = vmatpush1.bf16.msra.mxu1 %v3023_v4  ;;  %v3123_v3 = vld [vmem:[%s3552_s10 + $0x4ec] ss:$16 sps:$4 sm:$0xff]   ;;  %v3118_v4 = vld [vmem:[%s3552_s10 + $0x4e0] ss:$16 sps:$4 sm:$0xff]  }
  0xd1   : > { %1176 = vmatprep.subr.bf16.mxu0 %v3028_v5  ;;  %1258 = vmatprep.subr.bf16.mxu1 %v3031_v6  ;;  %v3121_v5 = vld [vmem:[%s3552_s10 + $0x4e8] ss:$16 sps:$4 sm:$0xff]   ;;  %v3126_v6 = vld [vmem:[%s3552_s10 + $0x504] ss:$16 sps:$4 sm:$0xff]  }
  0xd4   : > { %1177 = vmatpush1.bf16.msra.mxu0 %v3026_v7  ;;  %1259 = vmatpush1.bf16.msra.mxu1 %v3029_v8  ;;  %v3129_v7 = vld [vmem:[%s3552_s10 + $0x50c] ss:$16 sps:$4 sm:$0xff]   ;;  %v3124_v8 = vld [vmem:[%s3552_s10 + $0x500] ss:$16 sps:$4 sm:$0xff]  }
  0xd5   : > { %1178 = vmatprep.subr.bf16.mxu0 %v3034_v9  ;;  %1260 = vmatprep.subr.bf16.mxu1 %v3037_v10  ;;  %v3127_v9 = vld [vmem:[%s3552_s10 + $0x508] ss:$16 sps:$4 sm:$0xff]   ;;  %v3132_v10 = vld [vmem:[%s3552_s10 + $0x524] ss:$16 sps:$4 sm:$0xff]  }
  0xd8   : > { %1179 = vmatpush1.bf16.msra.mxu0 %v3032_v11  ;;  %1261 = vmatpush1.bf16.msra.mxu1 %v3035_v12  ;;  %v3135_v11 = vld [vmem:[%s3552_s10 + $0x52c] ss:$16 sps:$4 sm:$0xff]   ;;  %v3130_v12 = vld [vmem:[%s3552_s10 + $0x520] ss:$16 sps:$4 sm:$0xff]  }
  0xd9   : > { %1180 = vmatprep.subr.bf16.mxu0 %v3040_v13  ;;  %1262 = vmatprep.subr.bf16.mxu1 %v3043_v14  ;;  %v3133_v13 = vld [vmem:[%s3552_s10 + $0x528] ss:$16 sps:$4 sm:$0xff]   ;;  %v3138_v14 = vld [vmem:[%s3552_s10 + $0x544] ss:$16 sps:$4 sm:$0xff]  }
  0xdc   : > { %1181 = vmatpush1.bf16.msra.mxu0 %v3038_v15  ;;  %1263 = vmatpush1.bf16.msra.mxu1 %v3041_v16  ;;  %v3141_v15 = vld [vmem:[%s3552_s10 + $0x54c] ss:$16 sps:$4 sm:$0xff]   ;;  %v3136_v16 = vld [vmem:[%s3552_s10 + $0x540] ss:$16 sps:$4 sm:$0xff]  }
  0xdd   : > { %1182 = vmatprep.subr.bf16.mxu0 %v3046_v17  ;;  %1264 = vmatprep.subr.bf16.mxu1 %v3049_v18  ;;  %v3139_v17 = vld [vmem:[%s3552_s10 + $0x548] ss:$16 sps:$4 sm:$0xff]   ;;  %v3144_v18 = vld [vmem:[%s3552_s10 + $0x564] ss:$16 sps:$4 sm:$0xff]  }
  0xe0   : > { %1183 = vmatpush1.bf16.msra.mxu0 %v3044_v19  ;;  %1265 = vmatpush1.bf16.msra.mxu1 %v3047_v20  ;;  %v3147_v19 = vld [vmem:[%s3552_s10 + $0x56c] ss:$16 sps:$4 sm:$0xff]   ;;  %v3142_v20 = vld [vmem:[%s3552_s10 + $0x560] ss:$16 sps:$4 sm:$0xff]  }
  0xe1   : > { %1184 = vmatprep.subr.bf16.mxu0 %v3052_v21  ;;  %1266 = vmatprep.subr.bf16.mxu1 %v3055_v22  ;;  %v3145_v21 = vld [vmem:[%s3552_s10 + $0x568] ss:$16 sps:$4 sm:$0xff]   ;;  %v3150_v22 = vld [vmem:[%s3552_s10 + $0x584] ss:$16 sps:$4 sm:$0xff]  }
  0xe4   : > { %1185 = vmatpush1.bf16.msra.mxu0 %v3050_v23  ;;  %1267 = vmatpush1.bf16.msra.mxu1 %v3053_v24  ;;  %v3153_v23 = vld [vmem:[%s3552_s10 + $0x58c] ss:$16 sps:$4 sm:$0xff]   ;;  %v3148_v24 = vld [vmem:[%s3552_s10 + $0x580] ss:$16 sps:$4 sm:$0xff]  }
  0xe5   : > { %1186 = vmatprep.subr.bf16.mxu0 %v3058_v25  ;;  %1268 = vmatprep.subr.bf16.mxu1 %v3061_v26  ;;  %v3151_v25 = vld [vmem:[%s3552_s10 + $0x588] ss:$16 sps:$4 sm:$0xff]   ;;  %v3156_v26 = vld [vmem:[%s3552_s10 + $0x5a4] ss:$16 sps:$4 sm:$0xff]  }
  0xe8   : > { %1187 = vmatpush1.bf16.msra.mxu0 %v3056_v27  ;;  %1269 = vmatpush1.bf16.msra.mxu1 %v3059_v28  ;;  %v3159_v27 = vld [vmem:[%s3552_s10 + $0x5ac] ss:$16 sps:$4 sm:$0xff]   ;;  %v3154_v28 = vld [vmem:[%s3552_s10 + $0x5a0] ss:$16 sps:$4 sm:$0xff]  }
  0xe9   : > { %1188 = vmatprep.subr.bf16.mxu0 %v3064_v29  ;;  %1270 = vmatprep.subr.bf16.mxu1 %v3067_v30  ;;  %v3157_v29 = vld [vmem:[%s3552_s10 + $0x5a8] ss:$16 sps:$4 sm:$0xff]   ;;  %v3162_v30 = vld [vmem:[%s3552_s10 + $0x5c4] ss:$16 sps:$4 sm:$0xff]  }
  0xec   : > { %1189 = vmatpush1.bf16.msra.mxu0 %v3062_v31  ;;  %1271 = vmatpush1.bf16.msra.mxu1 %v3065_v32  ;;  %v3165_v31 = vld [vmem:[%s3552_s10 + $0x5cc] ss:$16 sps:$4 sm:$0xff]   ;;  %v3160_v32 = vld [vmem:[%s3552_s10 + $0x5c0] ss:$16 sps:$4 sm:$0xff]  }
  0xed   : > { %1190 = vmatprep.subr.bf16.mxu0 %v3070_v33  ;;  %1272 = vmatprep.subr.bf16.mxu1 %v3073_v34  ;;  %v3163_v33 = vld [vmem:[%s3552_s10 + $0x5c8] ss:$16 sps:$4 sm:$0xff]   ;;  %v3168_v34 = vld [vmem:[%s3552_s10 + $0x5e4] ss:$16 sps:$4 sm:$0xff]  }
  0xf0   : > { %1191 = vmatpush1.bf16.msra.mxu0 %v3068_v35  ;;  %1273 = vmatpush1.bf16.msra.mxu1 %v3071_v36  ;;  %v3171_v35 = vld [vmem:[%s3552_s10 + $0x5ec] ss:$16 sps:$4 sm:$0xff]   ;;  %v3166_v36 = vld [vmem:[%s3552_s10 + $0x5e0] ss:$16 sps:$4 sm:$0xff]  }
  0xf1   : > { %2113 = vmatprep.subr.bf16.mxu0 %v3078_v37  ;;  %2195 = vmatprep.subr.bf16.mxu1 %v3081_v38  ;;  %v3169_v37 = vld [vmem:[%s3552_s10 + $0x5e8] ss:$16 sps:$4 sm:$0xff]   ;;  %v3174_v38 = vld [vmem:[%s3552_s10 + $0x604] ss:$16 sps:$4 sm:$0xff]  }
  0xf3   : > { %1193 = vmatmul.mubr.bf16.vlgmr.msra.gmra.mrb[0].mxu0 %v2397_v41  ;;  %1275 = vmatmul.mubr.bf16.vlgmr.msra.gmra.mrb[0].mxu1 %v2397_v41 }
  0xf4   : > { %2114 = vmatpush1.bf16.msra.mxu0 %v3076_v39  ;;  %2196 = vmatpush1.bf16.msra.mxu1 %v3079_v40  ;;  %v3177_v39 = vld [vmem:[%s3552_s10 + $0x60c] ss:$16 sps:$4 sm:$0xff]   ;;  %v445_v40 = vlaneseq }
  0xf5   : > { %2115 = vmatprep.subr.bf16.mxu0 %v3084_v42  ;;  %2197 = vmatprep.subr.bf16.mxu1 %v3087_v43 }
  0xf6   : > { %v3768_v41 = vshrl.u32 %v445_v40, 7  ;;  %v3220_v40 = vld [vmem:[%s3552_s10 + $0x700] ss:$16 sps:$4 sm:$0xff]  }
  0xf8   : > { %2116 = vmatpush1.bf16.msra.mxu0 %v3082_v44  ;;  %2198 = vmatpush1.bf16.msra.mxu1 %v3085_v45  ;;  %v447_v42 = vsub.s32 0, %v3768_v41  ;;  %v455_v43 = vsub.s32 2, %v3768_v41  ;;  %v443_v44 = vld [vmem:[%s3558_s29] sm:$0xf]  ;;  %v451_v45 = vsub.s32 1, %v3768_v41 }
  0xf9   : > { %2117 = vmatprep.subr.bf16.mxu0 %v3090_v46  ;;  %2199 = vmatprep.subr.bf16.mxu1 %v3093_v47  ;;  %v459_v46 = vsub.s32 3, %v3768_v41 }
  0xfa   : > { %v448_v47 = vrot.slane %v443_v44, %v447_v42 }
  0xfc   : > { %2118 = vmatpush1.bf16.msra.mxu0 %v3088_v48  ;;  %2200 = vmatpush1.bf16.msra.mxu1 %v3091_v49  ;;  %v456_v48 = vrot.slane %v443_v44, %v455_v43  ;;  %v452_v49 = vrot.slane %v443_v44, %v451_v45 }
  0xfd   : > { %2119 = vmatprep.subr.bf16.mxu0 %v3096_v50  ;;  %2201 = vmatprep.subr.bf16.mxu1 %v3099_v51  ;;  %v460_v50 = vrot.slane %v443_v44, %v459_v46  ;;  %v3223_v44 = vld [vmem:[%s3552_s10 + $0x708] ss:$16 sps:$4 sm:$0xff]  }
 0x100   : > { %2120 = vmatpush1.bf16.msra.mxu0 %v3094_v52  ;;  %2202 = vmatpush1.bf16.msra.mxu1 %v3097_v53 }
 0x101   : > { %2121 = vmatprep.subr.bf16.mxu0 %v3102_v54  ;;  %2203 = vmatprep.subr.bf16.mxu1 %v3105_v55 }
 0x104   : > { %2122 = vmatpush1.bf16.msra.mxu0 %v3100_v56  ;;  %2204 = vmatpush1.bf16.msra.mxu1 %v3103_v57 }
 0x105   : > { %2123 = vmatprep.subr.bf16.mxu0 %v3108_v58  ;;  %2205 = vmatprep.subr.bf16.mxu1 %v3111_v59 }
 0x108   : > { %2124 = vmatpush1.bf16.msra.mxu0 %v3106_v60  ;;  %2206 = vmatpush1.bf16.msra.mxu1 %v3109_v61 }
 0x109   : > { %2125 = vmatprep.subr.bf16.mxu0 %v3114_v62  ;;  %2207 = vmatprep.subr.bf16.mxu1 %v3117_v63 }
 0x10c   : > { %2126 = vmatpush1.bf16.msra.mxu0 %v3112_v0  ;;  %2208 = vmatpush1.bf16.msra.mxu1 %v3115_v1 }
 0x10d   : > { %2127 = vmatprep.subr.bf16.mxu0 %v3120_v2  ;;  %2209 = vmatprep.subr.bf16.mxu1 %v3123_v3 }
 0x110   : > { %2128 = vmatpush1.bf16.msra.mxu0 %v3118_v4  ;;  %2210 = vmatpush1.bf16.msra.mxu1 %v3121_v5 }
 0x111   : > { %2129 = vmatprep.subr.bf16.mxu0 %v3126_v6  ;;  %2211 = vmatprep.subr.bf16.mxu1 %v3129_v7  ;;  %v3172_v7 = vld [vmem:[%s3552_s10 + $0x600] ss:$16 sps:$4 sm:$0xff]  }
 0x114   : > { %2130 = vmatpush1.bf16.msra.mxu0 %v3124_v8  ;;  %2212 = vmatpush1.bf16.msra.mxu1 %v3127_v9  ;;  %v3175_v8 = vld [vmem:[%s3552_s10 + $0x608] ss:$16 sps:$4 sm:$0xff]   ;;  %v3180_v9 = vld [vmem:[%s3552_s10 + $0x624] ss:$16 sps:$4 sm:$0xff]  }
 0x115   : > { %2131 = vmatprep.subr.bf16.mxu0 %v3132_v10  ;;  %2213 = vmatprep.subr.bf16.mxu1 %v3135_v11  ;;  %v3183_v10 = vld [vmem:[%s3552_s10 + $0x62c] ss:$16 sps:$4 sm:$0xff]  }
 0x118   : > { %2132 = vmatpush1.bf16.msra.mxu0 %v3130_v12  ;;  %2214 = vmatpush1.bf16.msra.mxu1 %v3133_v13  ;;  %v3178_v12 = vld [vmem:[%s3552_s10 + $0x620] ss:$16 sps:$4 sm:$0xff]   ;;  %v3181_v13 = vld [vmem:[%s3552_s10 + $0x628] ss:$16 sps:$4 sm:$0xff]  }
 0x119   : > { %2133 = vmatprep.subr.bf16.mxu0 %v3138_v14  ;;  %2215 = vmatprep.subr.bf16.mxu1 %v3141_v15  ;;  %v3186_v14 = vld [vmem:[%s3552_s10 + $0x644] ss:$16 sps:$4 sm:$0xff]   ;;  %v3189_v15 = vld [vmem:[%s3552_s10 + $0x64c] ss:$16 sps:$4 sm:$0xff]  }
 0x11c   : > { %2134 = vmatpush1.bf16.msra.mxu0 %v3136_v16  ;;  %2216 = vmatpush1.bf16.msra.mxu1 %v3139_v17  ;;  %v3184_v16 = vld [vmem:[%s3552_s10 + $0x640] ss:$16 sps:$4 sm:$0xff]   ;;  %v3187_v17 = vld [vmem:[%s3552_s10 + $0x648] ss:$16 sps:$4 sm:$0xff]  }
 0x11d   : > { %2135 = vmatprep.subr.bf16.mxu0 %v3144_v18  ;;  %2217 = vmatprep.subr.bf16.mxu1 %v3147_v19  ;;  %v3192_v18 = vld [vmem:[%s3552_s10 + $0x664] ss:$16 sps:$4 sm:$0xff]   ;;  %v3195_v19 = vld [vmem:[%s3552_s10 + $0x66c] ss:$16 sps:$4 sm:$0xff]  }
 0x120   : > { %2136 = vmatpush1.bf16.msra.mxu0 %v3142_v20  ;;  %2218 = vmatpush1.bf16.msra.mxu1 %v3145_v21  ;;  %v3190_v20 = vld [vmem:[%s3552_s10 + $0x660] ss:$16 sps:$4 sm:$0xff]   ;;  %v3193_v21 = vld [vmem:[%s3552_s10 + $0x668] ss:$16 sps:$4 sm:$0xff]  }
 0x121   : > { %2137 = vmatprep.subr.bf16.mxu0 %v3150_v22  ;;  %2219 = vmatprep.subr.bf16.mxu1 %v3153_v23  ;;  %v3198_v22 = vld [vmem:[%s3552_s10 + $0x684] ss:$16 sps:$4 sm:$0xff]   ;;  %v3201_v23 = vld [vmem:[%s3552_s10 + $0x68c] ss:$16 sps:$4 sm:$0xff]  }
 0x124   : > { %2138 = vmatpush1.bf16.msra.mxu0 %v3148_v24  ;;  %2220 = vmatpush1.bf16.msra.mxu1 %v3151_v25  ;;  %v3196_v24 = vld [vmem:[%s3552_s10 + $0x680] ss:$16 sps:$4 sm:$0xff]   ;;  %v3199_v25 = vld [vmem:[%s3552_s10 + $0x688] ss:$16 sps:$4 sm:$0xff]  }
 0x125   : > { %2139 = vmatprep.subr.bf16.mxu0 %v3156_v26  ;;  %2221 = vmatprep.subr.bf16.mxu1 %v3159_v27  ;;  %v3204_v26 = vld [vmem:[%s3552_s10 + $0x6a4] ss:$16 sps:$4 sm:$0xff]   ;;  %v3207_v27 = vld [vmem:[%s3552_s10 + $0x6ac] ss:$16 sps:$4 sm:$0xff]  }
 0x128   : > { %2140 = vmatpush1.bf16.msra.mxu0 %v3154_v28  ;;  %2222 = vmatpush1.bf16.msra.mxu1 %v3157_v29  ;;  %v3202_v28 = vld [vmem:[%s3552_s10 + $0x6a0] ss:$16 sps:$4 sm:$0xff]   ;;  %v3205_v29 = vld [vmem:[%s3552_s10 + $0x6a8] ss:$16 sps:$4 sm:$0xff]  }
 0x129   : > { %2141 = vmatprep.subr.bf16.mxu0 %v3162_v30  ;;  %2223 = vmatprep.subr.bf16.mxu1 %v3165_v31  ;;  %v3210_v30 = vld [vmem:[%s3552_s10 + $0x6c4] ss:$16 sps:$4 sm:$0xff]   ;;  %v3213_v31 = vld [vmem:[%s3552_s10 + $0x6cc] ss:$16 sps:$4 sm:$0xff]  }
 0x12c   : > { %2142 = vmatpush1.bf16.msra.mxu0 %v3160_v32  ;;  %2224 = vmatpush1.bf16.msra.mxu1 %v3163_v33  ;;  %v3208_v32 = vld [vmem:[%s3552_s10 + $0x6c0] ss:$16 sps:$4 sm:$0xff]   ;;  %v3211_v33 = vld [vmem:[%s3552_s10 + $0x6c8] ss:$16 sps:$4 sm:$0xff]  }
 0x12d   : > { %2143 = vmatprep.subr.bf16.mxu0 %v3168_v34  ;;  %2225 = vmatprep.subr.bf16.mxu1 %v3171_v35  ;;  %v3216_v34 = vld [vmem:[%s3552_s10 + $0x6e4] ss:$16 sps:$4 sm:$0xff]   ;;  %v3219_v35 = vld [vmem:[%s3552_s10 + $0x6ec] ss:$16 sps:$4 sm:$0xff]  }
 0x130   : > { %2144 = vmatpush1.bf16.msra.mxu0 %v3166_v36  ;;  %2226 = vmatpush1.bf16.msra.mxu1 %v3169_v37  ;;  %v3214_v36 = vld [vmem:[%s3552_s10 + $0x6e0] ss:$16 sps:$4 sm:$0xff]   ;;  %v3217_v37 = vld [vmem:[%s3552_s10 + $0x6e8] ss:$16 sps:$4 sm:$0xff]  }
 0x131   : > { %2154 = vmatprep.subr.bf16.mxu0 %v3174_v38  ;;  %2236 = vmatprep.subr.bf16.mxu1 %v3177_v39  ;;  %v3222_v38 = vld [vmem:[%s3552_s10 + $0x704] ss:$16 sps:$4 sm:$0xff]   ;;  %v3225_v39 = vld [vmem:[%s3552_s10 + $0x70c] ss:$16 sps:$4 sm:$0xff]  }
 0x1c6   : > { %v1194_v51 = vpop.f32.mrb[0].mxu0  ;;  %v1276_v52 = vpop.f32.mrb[0].mxu1 }
 0x1c7   : > { %v2806_v53 = vadd.f32 %v1194_v51, %v448_v47  ;;  %v2808_v54 = vadd.f32 %v1276_v52, %v456_v48  ;;  %v1196_v55 = vpop.f32.mrb[1].mxu0  ;;  %v1278_v56 = vpop.f32.mrb[1].mxu1  ;;  %v3228_v47 = vld [vmem:[%s3552_s10 + $0x724] ss:$16 sps:$4 sm:$0xff]   ;;  %v3231_v48 = vld [vmem:[%s3552_s10 + $0x72c] ss:$16 sps:$4 sm:$0xff]  }
 0x1c8   : > { %v2807_v57 = vadd.f32 %v1196_v55, %v452_v49  ;;  %v2809_v58 = vadd.f32 %v1278_v56, %v460_v50  ;;  %v1198_v59 = vpop.f32.mrb[2].mxu0  ;;  %v1280_v60 = vpop.f32.mrb[2].mxu1  ;;  %v3226_v49 = vld [vmem:[%s3552_s10 + $0x720] ss:$16 sps:$4 sm:$0xff]   ;;  %v3229_v50 = vld [vmem:[%s3552_s10 + $0x728] ss:$16 sps:$4 sm:$0xff]  }
 0x1c9   : > { %v1283_v61 = vmax.f32 %v2806_v53, 0.0  ;;  %v3783_v62 = vmax.f32 %v2808_v54, 0.0  ;;  %v1199_v63 = vpop.f32.mrb[3].mxu0  ;;  %v1281_v0 = vpop.f32.mrb[3].mxu1  ;;  %v3234_v51 = vld [vmem:[%s3552_s10 + $0x744] ss:$16 sps:$4 sm:$0xff]  }
 0x1ca   : > { %v1284_v1 = vmax.f32 %v2807_v57, 0.0  ;;  %v1286_v2 = vmax.f32 %v2809_v58, 0.0  ;;  %v3237_v52 = vld [vmem:[%s3552_s10 + $0x74c] ss:$16 sps:$4 sm:$0xff]   ;;  %v3232_v53 = vld [vmem:[%s3552_s10 + $0x740] ss:$16 sps:$4 sm:$0xff]  }
 0x1cb   : > { %v3268_v5 = vpack.c.bf16 %v1283_v61, %v1283_v61  ;;  %v3235_v54 = vld [vmem:[%s3552_s10 + $0x748] ss:$16 sps:$4 sm:$0xff]   ;;  %v3240_v55 = vld [vmem:[%s3552_s10 + $0x764] ss:$16 sps:$4 sm:$0xff]   ;;  %v3243_v56 = vld [vmem:[%s3552_s10 + $0x76c] ss:$16 sps:$4 sm:$0xff]  }
 0x1cc   : > { %v2802_v3 = vpack.c.bf16 %v1284_v1, %v1283_v61  ;;  %v2803_v4 = vpack.c.bf16 %v1286_v2, %v3783_v62  ;;  %v3269_v6 = vpack.c.bf16 %v1284_v1, %v1284_v1  ;;  %v3270_v11 = vpack.c.bf16 %v1286_v2, %v1286_v2  ;;  %v3238_v57 = vld [vmem:[%s3552_s10 + $0x760] ss:$16 sps:$4 sm:$0xff]   ;;  %v3241_v58 = vld [vmem:[%s3552_s10 + $0x768] ss:$16 sps:$4 sm:$0xff]   ;;  %v3246_v59 = vld [vmem:[%s3552_s10 + $0x784] ss:$16 sps:$4 sm:$0xff]  }
 0x1cd   : > { %v3249_v60 = vld [vmem:[%s3552_s10 + $0x78c] ss:$16 sps:$4 sm:$0xff]   ;;  %v3244_v61 = vld [vmem:[%s3552_s10 + $0x780] ss:$16 sps:$4 sm:$0xff]   ;;  %v3247_v63 = vld [vmem:[%s3552_s10 + $0x788] ss:$16 sps:$4 sm:$0xff]  }
 0x1ce   : > { %1303 = vst [vmem:[#allocation2] sm:$0xff] %v2802_v3  ;;  %1304 = vst [vmem:[#allocation2 + $0x8] sm:$0xff] %v2803_v4  ;;  %2145 = vmatprep.mubr.bf16.mxu0 %v3269_v6  ;;  %2227 = vmatprep.mubr.bf16.mxu1 %v3269_v6  ;;  %v3252_v0 = vld [vmem:[%s3552_s10 + $0x7a4] ss:$16 sps:$4 sm:$0xff]   ;;  %v3255_v1 = vld [vmem:[%s3552_s10 + $0x7ac] ss:$16 sps:$4 sm:$0xff]  }
 0x1cf   : > { %2146 = vmatmul.mubr.bf16.vlgmr.msra.gmra.mrb[4].mxu0 %v3268_v5  ;;  %2228 = vmatmul.mubr.bf16.vlgmr.msra.gmra.mrb[4].mxu1 %v3268_v5  ;;  %v3250_v2 = vld [vmem:[%s3552_s10 + $0x7a0] ss:$16 sps:$4 sm:$0xff]   ;;  %v3253_v3 = vld [vmem:[%s3552_s10 + $0x7a8] ss:$16 sps:$4 sm:$0xff]   ;;  %v3258_v4 = vld [vmem:[%s3552_s10 + $0x7c4] ss:$16 sps:$4 sm:$0xff]  }
 0x1d0   : > { %2155 = vmatpush1.bf16.msra.mxu0 %v3172_v7  ;;  %2237 = vmatpush1.bf16.msra.mxu1 %v3175_v8  ;;  %v3261_v5 = vld [vmem:[%s3552_s10 + $0x7cc] ss:$16 sps:$4 sm:$0xff]   ;;  %v3256_v6 = vld [vmem:[%s3552_s10 + $0x7c0] ss:$16 sps:$4 sm:$0xff]   ;;  %v3259_v7 = vld [vmem:[%s3552_s10 + $0x7c8] ss:$16 sps:$4 sm:$0xff]  }
 0x1d1   : > { %2186 = vmatprep.mubr.bf16.mxu0 %v3270_v11  ;;  %2268 = vmatprep.mubr.bf16.mxu1 %v3270_v11  ;;  %v3264_v8 = vld [vmem:[%s3552_s10 + $0x7e4] ss:$16 sps:$4 sm:$0xff]   ;;  %v3265_v11 = vld [vmem:[%s3552_s10 + $0x7e8] ss:$16 sps:$4 sm:$0xff]  }
 0x1d2   : > { %2156 = vmatprep.subr.bf16.mxu0 %v3180_v9  ;;  %2238 = vmatprep.subr.bf16.mxu1 %v3183_v10  ;;  %v3267_v9 = vld [vmem:[%s3552_s10 + $0x7ec] ss:$16 sps:$4 sm:$0xff]   ;;  %v3262_v10 = vld [vmem:[%s3552_s10 + $0x7e0] ss:$16 sps:$4 sm:$0xff]  }
 0x1d4   : > { %2157 = vmatpush1.bf16.msra.mxu0 %v3178_v12  ;;  %2239 = vmatpush1.bf16.msra.mxu1 %v3181_v13  ;;  %v3271_v12 = vpack.c.bf16 %v3783_v62, %v3783_v62  ;;  %v2657_v13 = vld [vmem:[%s3558_s29 + $0x4] sm:$0xf] }
 0x1d5   : > { %2158 = vmatprep.subr.bf16.mxu0 %v3186_v14  ;;  %2240 = vmatprep.subr.bf16.mxu1 %v3189_v15  ;;  %v1442_v14 = vrot.slane %v2657_v13, %v447_v42  ;;  %v1450_v15 = vrot.slane %v2657_v13, %v455_v43 }
 0x1d8   : > { %2159 = vmatpush1.bf16.msra.mxu0 %v3184_v16  ;;  %2241 = vmatpush1.bf16.msra.mxu1 %v3187_v17  ;;  %v1446_v16 = vrot.slane %v2657_v13, %v451_v45  ;;  %v1454_v17 = vrot.slane %v2657_v13, %v459_v46 }
 0x1d9   : > { %2160 = vmatprep.subr.bf16.mxu0 %v3192_v18  ;;  %2242 = vmatprep.subr.bf16.mxu1 %v3195_v19 }
 0x1dc   : > { %2161 = vmatpush1.bf16.msra.mxu0 %v3190_v20  ;;  %2243 = vmatpush1.bf16.msra.mxu1 %v3193_v21 }
 0x1dd   : > { %2162 = vmatprep.subr.bf16.mxu0 %v3198_v22  ;;  %2244 = vmatprep.subr.bf16.mxu1 %v3201_v23 }
 0x1e0   : > { %2163 = vmatpush1.bf16.msra.mxu0 %v3196_v24  ;;  %2245 = vmatpush1.bf16.msra.mxu1 %v3199_v25 }
 0x1e1   : > { %2164 = vmatprep.subr.bf16.mxu0 %v3204_v26  ;;  %2246 = vmatprep.subr.bf16.mxu1 %v3207_v27 }
 0x1e4   : > { %2165 = vmatpush1.bf16.msra.mxu0 %v3202_v28  ;;  %2247 = vmatpush1.bf16.msra.mxu1 %v3205_v29 }
 0x1e5   : > { %2166 = vmatprep.subr.bf16.mxu0 %v3210_v30  ;;  %2248 = vmatprep.subr.bf16.mxu1 %v3213_v31 }
 0x1e8   : > { %2167 = vmatpush1.bf16.msra.mxu0 %v3208_v32  ;;  %2249 = vmatpush1.bf16.msra.mxu1 %v3211_v33 }
 0x1e9   : > { %2168 = vmatprep.subr.bf16.mxu0 %v3216_v34  ;;  %2250 = vmatprep.subr.bf16.mxu1 %v3219_v35 }
 0x1ec   : > { %2169 = vmatpush1.bf16.msra.mxu0 %v3214_v36  ;;  %2251 = vmatpush1.bf16.msra.mxu1 %v3217_v37 }
 0x1ed   : > { %2170 = vmatprep.subr.bf16.mxu0 %v3222_v38  ;;  %2252 = vmatprep.subr.bf16.mxu1 %v3225_v39 }
 0x1f0   : > { %2171 = vmatpush1.bf16.msra.mxu0 %v3220_v40  ;;  %2253 = vmatpush1.bf16.msra.mxu1 %v3223_v44 }
 0x1f1   : > { %2172 = vmatprep.subr.bf16.mxu0 %v3228_v47  ;;  %2254 = vmatprep.subr.bf16.mxu1 %v3231_v48 }
 0x1f4   : > { %2173 = vmatpush1.bf16.msra.mxu0 %v3226_v49  ;;  %2255 = vmatpush1.bf16.msra.mxu1 %v3229_v50 }
 0x1f5   : > { %2174 = vmatprep.subr.bf16.mxu0 %v3234_v51  ;;  %2256 = vmatprep.subr.bf16.mxu1 %v3237_v52 }
 0x1f8   : > { %2175 = vmatpush1.bf16.msra.mxu0 %v3232_v53  ;;  %2257 = vmatpush1.bf16.msra.mxu1 %v3235_v54 }
 0x1f9   : > { %2176 = vmatprep.subr.bf16.mxu0 %v3240_v55  ;;  %2258 = vmatprep.subr.bf16.mxu1 %v3243_v56 }
 0x1fc   : > { %2177 = vmatpush1.bf16.msra.mxu0 %v3238_v57  ;;  %2259 = vmatpush1.bf16.msra.mxu1 %v3241_v58 }
 0x1fd   : > { %2178 = vmatprep.subr.bf16.mxu0 %v3246_v59  ;;  %2260 = vmatprep.subr.bf16.mxu1 %v3249_v60 }
 0x200   : > { %2179 = vmatpush1.bf16.msra.mxu0 %v3244_v61  ;;  %2261 = vmatpush1.bf16.msra.mxu1 %v3247_v63 }
 0x201   : > { %2180 = vmatprep.subr.bf16.mxu0 %v3252_v0  ;;  %2262 = vmatprep.subr.bf16.mxu1 %v3255_v1 }
 0x204   : > { %2181 = vmatpush1.bf16.msra.mxu0 %v3250_v2  ;;  %2263 = vmatpush1.bf16.msra.mxu1 %v3253_v3 }
 0x205   : > { %2182 = vmatprep.subr.bf16.mxu0 %v3258_v4  ;;  %2264 = vmatprep.subr.bf16.mxu1 %v3261_v5 }
 0x208   : > { %2183 = vmatpush1.bf16.msra.mxu0 %v3256_v6  ;;  %2265 = vmatpush1.bf16.msra.mxu1 %v3259_v7 }
 0x209   : > { %2184 = vmatprep.subr.bf16.mxu0 %v3264_v8  ;;  %2266 = vmatprep.subr.bf16.mxu1 %v3267_v9 }
 0x20c   : > { %2185 = vmatpush1.bf16.msra.mxu0 %v3262_v10  ;;  %2267 = vmatpush1.bf16.msra.mxu1 %v3265_v11 }
 0x20f   : > { %2187 = vmatmul.mubr.bf16.vlgmr.msra.gmra.mrb[4].mxu0 %v3271_v12  ;;  %2269 = vmatmul.mubr.bf16.vlgmr.msra.gmra.mrb[4].mxu1 %v3271_v12 }
 0x2df   : > { %2280 = sbr.rel (%p2790_p2) target bundleno = 747 (0x2eb), region = 48 }
 0x2e2   : > { %v2188_v18 = vpop.f32.mrb[4].mxu0  ;;  %v2270_v19 = vpop.f32.mrb[4].mxu1 }
 0x2e3   : > { %v2810_v20 = vadd.f32 %v2188_v18, %v1442_v14  ;;  %v2812_v21 = vadd.f32 %v2270_v19, %v1450_v15  ;;  %v2190_v62 = vpop.f32.mrb[5].mxu0  ;;  %v2272_v22 = vpop.f32.mrb[5].mxu1 }
 0x2e4   : > { %v2811_v23 = vadd.f32 %v2190_v62, %v1446_v16  ;;  %v2813_v24 = vadd.f32 %v2272_v22, %v1454_v17  ;;  %v2192_v25 = vpop.f32.mrb[6].mxu0  ;;  %v2274_v26 = vpop.f32.mrb[6].mxu1 }
 0x2e5   : > { %v2193_v42 = vpop.f32.mrb[7].mxu0  ;;  %v2275_v27 = vpop.f32.mrb[7].mxu1  ;;  %v2281_v43 = vmax.f32 (!%p2790_p2), %v2810_v20, 0.0  ;;  %v2283_v28 = vmax.f32 (!%p2790_p2), %v2812_v21, 0.0 }
 0x2e6   : > { %v2282_v45 = vmax.f32 %v2811_v23, 0.0  ;;  %v2284_v41 = vmax.f32 %v2813_v24, 0.0 }
 0x2e8   : > { %v2804_v46 = vpack.c.bf16 %v2282_v45, %v2281_v43  ;;  %v2805_v29 = vpack.c.bf16 %v2284_v41, %v2283_v28 }
 0x2ea   : > { %2301 = vst [vmem:[#allocation2] sm:$0xff] %v2804_v46  ;;  %2302 = vst [vmem:[#allocation2 + $0x8] sm:$0xff] %v2805_v29 }
 0x2eb PF: > { %p2793_p8 = scmp.ne.s32.totalorder %s3441_s23, 2 }
 0x2ec   : > { %2307 = vst [vmem:[%s3890_s4] sm:$0xff] (!%p2793_p8), %v2810_v20  ;;  %2308 = vst [vmem:[%s3890_s4 + $0x8] sm:$0xff] (!%p2793_p8), %v2811_v23 }
 0x2ed   : > { %2306 = sbr.rel (%p2793_p8) target bundleno = 756 (0x2f4), region = 52  ;;  %2309 = vst [vmem:[%s3890_s4 + $0x10] sm:$0xff] (!%p2793_p8), %v2812_v21  ;;  %2310 = vst [vmem:[%s3890_s4 + $0x18] sm:$0xff] (!%p2793_p8), %v2813_v24 }
 0x2f4 PF: > { %p23_p11 = scmp.ge.s32.totalorder %s3444_s24, 5   ;;  %s3897_s20 = smov %s3376_s0 }
 0x2f5   : > { %s3898_s0 = smov %s3380_s21  ;;  %s3899_s21 = smov %s3454_s27 }
 0x2f6   : > { %s3900_s22 = smov %s3444_s24  ;;  %25 = sbr.rel (!%p23_p11) target bundleno = 20 (0x14), region = 95 }
 0x2fd   :  { %2322 = vsyncpa [#allocation6], 1 }
 0x2fe   :  { %2324 = vsyncpa [#allocation6 + $0x1], 1 }
 0x2ff   :  { %2325 = vsyncpa [#allocation8], 1 }
 0x300   :  { %2327 = vsyncpa [#allocation8 + $0x1], 1 }

</bundles_post_ra>
